<compile_context>
chip_gen: v7x
topology: tpu7x:2x2x1
jax: 0.10.0
libtpu: 0.0.40
codegen_flags: <defaults>
</compile_context>

<pallas_src>
import jax
import jax.numpy as jnp
from jax.experimental import pallas as pl
from jax.experimental.pallas import tpu as pltpu


def _round_up(x, m):
    return ((x + m - 1) // m) * m


def _disc_kernel(x_ref, w1_ref, b1_ref, w2_ref, b2_ref, w3_ref, b3_ref,
                 out_ref, acc_ref):
    """Grid = (batch_tiles, k_tiles). Layer-1 matmul accumulated over k."""
    k = pl.program_id(1)

    @pl.when(k == 0)
    def _():
        acc_ref[...] = jnp.zeros_like(acc_ref)

    # Layer 1 partial product: x tile is f32 in VMEM, cast to bf16 on the VPU
    # (hidden under the w1 DMA), f32 MXU accumulation.
    acc_ref[...] += jnp.dot(x_ref[...].astype(jnp.bfloat16), w1_ref[...],
                            preferred_element_type=jnp.float32)

    @pl.when(k == pl.num_programs(1) - 1)
    def _():
        # Epilogue (once per batch tile): bias + LeakyReLU, layers 2 & 3.
        h1 = acc_ref[...] + b1_ref[...]
        h1 = jnp.maximum(h1, 0.2 * h1)

        # Layer 2: Linear(512, 256) + LeakyReLU(0.2), bf16 MXU / f32 acc.
        h2 = jnp.dot(h1.astype(jnp.bfloat16), w2_ref[...],
                     preferred_element_type=jnp.float32) + b2_ref[...]
        h2 = jnp.maximum(h2, 0.2 * h2)

        # Layer 3: Linear(256, 1) + Sigmoid, produced lane-dense as (1, tm):
        # contract w3 (1,256) with h2 (tm,256) over the 256 axis.
        h3 = jnp.einsum('on,mn->om', w3_ref[...], h2,
                        preferred_element_type=jnp.float32) + b3_ref[...]
        out_ref[...] = jax.nn.sigmoid(h3)


def prepare_params(params, *, tk_target=None):
    """One-time prep: bf16 weights, zero-padded w1 K rows, balanced K tiling.

    Do this once (at init / param-update time) and reuse across forward calls
    so the dominant w1 HBM stream is read exactly once per call, in bf16.
    """
    w1, b1, w2, b2, w3, b3 = params
    F = int(w1.shape[0])

    if tk_target is None:
        try:
            kind = jax.devices()[0].device_kind.lower()
            tk_target = 2048 if "v5" in kind else 4096
        except Exception:  # pragma: no cover - conservative fallback
            tk_target = 2048

    # Balanced K tiles: padding is at most ~one 128-lane stripe, never a
    # whole tk (old rule padded F=3072 -> 4096 at tk=2048).
    f128 = _round_up(max(F, 128), 128)
    nk = pl.cdiv(f128, tk_target)
    tk = _round_up(pl.cdiv(f128, nk), 128)
    f_pad = tk * nk

    prepared = {
        "w1": jnp.pad(w1, ((0, f_pad - F), (0, 0))).astype(jnp.bfloat16),
        "b1": b1,
        "w2": w2.astype(jnp.bfloat16),
        "b2": b2,
        "w3": w3,
        "b3": b3,
        "F": F,
        "F_pad": int(f_pad),
        "tk": int(tk),
        "nk": int(nk),
        "H1": int(w1.shape[1]),
        "H2": int(w2.shape[1]),
    }
    return prepared


def discriminator_forward(img, prepared, *, tm=128):
    """img: (B, C, H, W) float32. Returns (B, 1) float32 validity scores."""
    B = int(img.shape[0])
    F, F_pad, tk, nk = prepared["F"], prepared["F_pad"], prepared["tk"], prepared["nk"]
    H1, H2 = prepared["H1"], prepared["H2"]
    assert int(img.shape[1] * img.shape[2] * img.shape[3]) == F

    # Glue: NCHW flatten, same order as torch `img.view(B, -1)`. x stays f32;
    # only the (rare) non-128-aligned K overhang is zero-padded so the
    # padded-x columns meet zero-padded w1 rows (garbage-free).
    x = img.reshape(B, F)
    if F_pad != F:
        x = jnp.pad(x, ((0, 0), (0, F_pad - F)))

    # Batch tile: multiple of 8 (f32 sublane tile); keep >= 2 tiles whenever B
    # allows so the "parallel" batch axis can shard across dual-TC chips.
    tm = min(tm, _round_up(max(1, -(-B // 2)), 8))
    tm = max(8, _round_up(tm, 8))
    nb = -(-B // tm)  # cdiv; partial last tile handled by Pallas block padding

    out = pl.pallas_call(
        _disc_kernel,
        out_shape=jax.ShapeDtypeStruct((nb, tm), jnp.float32),
        grid=(nb, nk),
        in_specs=[
            pl.BlockSpec((tm, tk), lambda i, k: (i, k)),   # x batch/K tile (f32)
            pl.BlockSpec((tk, H1), lambda i, k: (k, 0)),   # w1 K tile (bf16)
            pl.BlockSpec((1, H1), lambda i, k: (0, 0)),    # b1 (resident, f32)
            pl.BlockSpec((H1, H2), lambda i, k: (0, 0)),   # w2 (resident, bf16)
            pl.BlockSpec((1, H2), lambda i, k: (0, 0)),    # b2 (f32)
            pl.BlockSpec((1, H2), lambda i, k: (0, 0)),    # w3 row (f32)
            pl.BlockSpec((1, 1), lambda i, k: (0, 0)),     # b3 (f32)
        ],
        out_specs=pl.BlockSpec((1, tm), lambda i, k: (i, 0)),   # lane-dense
        scratch_shapes=[pltpu.VMEM((tm, H1), jnp.float32)],     # layer-1 acc
        compiler_params=pltpu.CompilerParams(
            dimension_semantics=("parallel", "arbitrary")),
    )(x, prepared["w1"], prepared["b1"], prepared["w2"], prepared["b2"],
      prepared["w3"], prepared["b3"])

    # (nb, tm) lane-dense slab -> (B, 1); rows >= B are padded-tile garbage.
    return out.reshape(nb * tm, 1)[:B]


def init_params(key, in_features):
    """nn.Linear-style init. Weights stored as (in, out); w3 as a (1, 256) row."""
    def uniform(k, shape, fan_in):
        bound = 1.0 / jnp.sqrt(fan_in)
        return jax.random.uniform(k, shape, jnp.float32, -bound, bound)

    k1, k2, k3, k4, k5, k6 = jax.random.split(key, 6)
    w1 = uniform(k1, (in_features, 512), in_features)
    b1 = uniform(k2, (1, 512), in_features)
    w2 = uniform(k3, (512, 256), 512)
    b2 = uniform(k4, (1, 256), 512)
    w3 = uniform(k5, (1, 256), 256)   # row layout: layer 3 contracts over lanes
    b3 = uniform(k6, (1, 1), 256)
    return (w1, b1, w2, b2, w3, b3)


if __name__ == "__main__":
    # Small shapes consistent with the module: Discriminator(IMG_SIZE=16, CHANNELS=4)
    B, C, H, W = 2, 4, 16, 16
    F = C * H * W  # 1024

    key = jax.random.PRNGKey(0)
    k_img, k_par = jax.random.split(key)
    img = jax.random.normal(k_img, (B, C, H, W), dtype=jnp.float32)
    params = init_params(k_par, F)

    prepared = prepare_params(params)            # one-time weight prep (hoisted)
    out = jax.block_until_ready(discriminator_forward(img, prepared))

    # Pure-JAX reference with matching numerics (bf16 weights/acts, f32 accumulate)
    w1, b1, w2, b2, w3, b3 = params
    x = img.reshape(B, F).astype(jnp.bfloat16)
    h1 = jnp.dot(x, w1.astype(jnp.bfloat16),
                 preferred_element_type=jnp.float32) + b1
    h1 = jnp.maximum(h1, 0.2 * h1)
    h2 = jnp.dot(h1.astype(jnp.bfloat16), w2.astype(jnp.bfloat16),
                 preferred_element_type=jnp.float32) + b2
    h2 = jnp.maximum(h2, 0.2 * h2)
    ref = jax.nn.sigmoid(jnp.sum(h2 * w3, axis=-1, keepdims=True) + b3)

    assert out.shape == (B, 1)
    assert jnp.allclose(out, ref, atol=1e-2, rtol=1e-2), (out, ref)

    print("KERNEL_OK")
</pallas_src>

<mosaic_0001>
module attributes {stable_mosaic.version = 11 : i64} {
  func.func @_disc_kernel(%arg0: i32, %arg1: i32, %arg2: memref<8x1024xf32, #tpu.memory_space<vmem>>, %arg3: memref<1024x512xbf16, #tpu.memory_space<vmem>>, %arg4: memref<1x512xf32, #tpu.memory_space<vmem>>, %arg5: memref<512x256xbf16, #tpu.memory_space<vmem>>, %arg6: memref<1x256xf32, #tpu.memory_space<vmem>>, %arg7: memref<1x256xf32, #tpu.memory_space<vmem>>, %arg8: memref<1x1xf32, #tpu.memory_space<vmem>>, %arg9: memref<1x8xf32, #tpu.memory_space<vmem>>, %arg10: memref<8x512xf32, #tpu.memory_space<vmem>>) attributes {dimension_semantics = [#tpu.dimension_semantics<parallel>, #tpu.dimension_semantics<arbitrary>], iteration_bounds = array<i64: 1, 1>, scalar_prefetch = 0 : i64, scratch_operands = 1 : i64, tpu.core_type = #tpu.core_type<tc>, window_params = [{transform_indices = @transform_0, window_bounds = array<i64: 8, 1024>}, {transform_indices = @transform_1, window_bounds = array<i64: 1024, 512>}, {pipeline_mode = #tpu.pipeline_mode<synchronous>, transform_indices = @transform_2, window_bounds = array<i64: 1, 512>}, {pipeline_mode = #tpu.pipeline_mode<synchronous>, transform_indices = @transform_3, window_bounds = array<i64: 512, 256>}, {pipeline_mode = #tpu.pipeline_mode<synchronous>, transform_indices = @transform_4, window_bounds = array<i64: 1, 256>}, {pipeline_mode = #tpu.pipeline_mode<synchronous>, transform_indices = @transform_5, window_bounds = array<i64: 1, 256>}, {pipeline_mode = #tpu.pipeline_mode<synchronous>, transform_indices = @transform_6, window_bounds = array<i64: 1, 1>}, {transform_indices = @transform_7, window_bounds = array<i64: 1, 8>}]} {
    %c0_i32 = arith.constant 0 : i32
    %0 = arith.cmpi eq, %arg1, %c0_i32 : i32
    %1 = arith.extui %0 : i1 to i32
    %c0_i32_0 = arith.constant 0 : i32
    %2 = arith.cmpi ne, %1, %c0_i32_0 : i32
    scf.if %2 {
      %cst_10 = arith.constant 0.000000e+00 : f32
      %13 = vector.broadcast %cst_10 : f32 to vector<8x512xf32>
      %c0_11 = arith.constant 0 : index
      %c0_12 = arith.constant 0 : index
      %14 = vector.load %arg10[%c0_11, %c0_12] : memref<8x512xf32, #tpu.memory_space<vmem>>, vector<8x512xf32>
      tpu.vector_store %arg10[%c0_11, %c0_12], %13 {strides = array<i32>} : memref<8x512xf32, #tpu.memory_space<vmem>>, vector<8x512xf32>,
    } else {
    }
    %c0 = arith.constant 0 : index
    %c0_1 = arith.constant 0 : index
    %3 = vector.load %arg10[%c0, %c0_1] : memref<8x512xf32, #tpu.memory_space<vmem>>, vector<8x512xf32>
    %c0_2 = arith.constant 0 : index
    %c0_3 = arith.constant 0 : index
    %4 = vector.load %arg2[%c0_2, %c0_3] : memref<8x1024xf32, #tpu.memory_space<vmem>>, vector<8x1024xf32>
    %5 = arith.truncf %4 : vector<8x1024xf32> to vector<8x1024xbf16>
    %c0_4 = arith.constant 0 : index
    %c0_5 = arith.constant 0 : index
    %6 = vector.load %arg3[%c0_4, %c0_5] : memref<1024x512xbf16, #tpu.memory_space<vmem>>, vector<1024x512xbf16>
    %cst = arith.constant dense<0.000000e+00> : vector<8x512xf32>
    %7 = tpu.matmul %5, %6, %cst {dimension_numbers = #tpu.dot_dimension_numbers<[1], [0], [0], [1], [0, 0, 1, 1], [], []>} : vector<8x1024xbf16>, vector<1024x512xbf16>, vector<8x512xf32> -> vector<8x512xf32>
    %8 = arith.addf %3, %7 : vector<8x512xf32>
    %c0_6 = arith.constant 0 : index
    %c0_7 = arith.constant 0 : index
    %9 = vector.load %arg10[%c0_6, %c0_7] : memref<8x512xf32, #tpu.memory_space<vmem>>, vector<8x512xf32>
    tpu.vector_store %arg10[%c0_6, %c0_7], %8 {strides = array<i32>} : memref<8x512xf32, #tpu.memory_space<vmem>>, vector<8x512xf32>,
    %c0_i32_8 = arith.constant 0 : i32
    %10 = arith.cmpi eq, %arg1, %c0_i32_8 : i32
    %11 = arith.extui %10 : i1 to i32
    %c0_i32_9 = arith.constant 0 : i32
    %12 = arith.cmpi ne, %11, %c0_i32_9 : i32
    scf.if %12 {
      %c0_10 = arith.constant 0 : index
      %c0_11 = arith.constant 0 : index
      %13 = vector.load %arg10[%c0_10, %c0_11] : memref<8x512xf32, #tpu.memory_space<vmem>>, vector<8x512xf32>
      %c0_12 = arith.constant 0 : index
      %c0_13 = arith.constant 0 : index
      %14 = vector.load %arg4[%c0_12, %c0_13] : memref<1x512xf32, #tpu.memory_space<vmem>>, vector<1x512xf32>
      %15 = vector.broadcast %14 : vector<1x512xf32> to vector<8x512xf32>
      %16 = arith.addf %13, %15 : vector<8x512xf32>
      %cst_14 = arith.constant 2.000000e-01 : f32
      %17 = vector.broadcast %cst_14 : f32 to vector<8x512xf32>
      %18 = arith.mulf %17, %16 : vector<8x512xf32>
      %19 = arith.maximumf %16, %18 : vector<8x512xf32>
      %20 = arith.truncf %19 : vector<8x512xf32> to vector<8x512xbf16>
      %c0_15 = arith.constant 0 : index
      %c0_16 = arith.constant 0 : index
      %21 = vector.load %arg5[%c0_15, %c0_16] : memref<512x256xbf16, #tpu.memory_space<vmem>>, vector<512x256xbf16>
      %cst_17 = arith.constant dense<0.000000e+00> : vector<8x256xf32>
      %22 = tpu.matmul %20, %21, %cst_17 {dimension_numbers = #tpu.dot_dimension_numbers<[1], [0], [0], [1], [0, 0, 1, 1], [], []>} : vector<8x512xbf16>, vector<512x256xbf16>, vector<8x256xf32> -> vector<8x256xf32>
      %c0_18 = arith.constant 0 : index
      %c0_19 = arith.constant 0 : index
      %23 = vector.load %arg6[%c0_18, %c0_19] : memref<1x256xf32, #tpu.memory_space<vmem>>, vector<1x256xf32>
      %24 = vector.broadcast %23 : vector<1x256xf32> to vector<8x256xf32>
      %25 = arith.addf %22, %24 : vector<8x256xf32>
      %cst_20 = arith.constant 2.000000e-01 : f32
      %26 = vector.broadcast %cst_20 : f32 to vector<8x256xf32>
      %27 = arith.mulf %26, %25 : vector<8x256xf32>
      %28 = arith.maximumf %25, %27 : vector<8x256xf32>
      %c0_21 = arith.constant 0 : index
      %c0_22 = arith.constant 0 : index
      %29 = vector.load %arg7[%c0_21, %c0_22] : memref<1x256xf32, #tpu.memory_space<vmem>>, vector<1x256xf32>
      "tpu.trace_start"() <{level = 10 : i32, message = "on,mn->om"}> : () -> ()
      %cst_23 = arith.constant dense<0.000000e+00> : vector<1x8xf32>
      %30 = tpu.matmul %29, %28, %cst_23 {dimension_numbers = #tpu.dot_dimension_numbers<[1], [1], [0], [0], [0, 0, 1, 0], [], []>} : vector<1x256xf32>, vector<8x256xf32>, vector<1x8xf32> -> vector<1x8xf32>
      "tpu.trace_stop"() : () -> ()
      %c0_24 = arith.constant 0 : index
      %c0_25 = arith.constant 0 : index
      %31 = vector.load %arg8[%c0_24, %c0_25] : memref<1x1xf32, #tpu.memory_space<vmem>>, vector<1x1xf32>
      %32 = vector.broadcast %31 : vector<1x1xf32> to vector<1x8xf32>
      %33 = arith.addf %30, %32 : vector<1x8xf32>
      %34 = arith.negf %33 : vector<1x8xf32>
      %35 = math.exp %34 : vector<1x8xf32>
      %cst_26 = arith.constant 1.000000e+00 : f32
      %36 = vector.broadcast %cst_26 : f32 to vector<1x8xf32>
      %37 = arith.addf %36, %35 : vector<1x8xf32>
      %38 = arith.divf %36, %37 : vector<1x8xf32>
      %c0_27 = arith.constant 0 : index
      %c0_28 = arith.constant 0 : index
      %39 = vector.load %arg9[%c0_27, %c0_28] : memref<1x8xf32, #tpu.memory_space<vmem>>, vector<1x8xf32>
      tpu.vector_store %arg9[%c0_27, %c0_28], %38 {strides = array<i32>} : memref<1x8xf32, #tpu.memory_space<vmem>>, vector<1x8xf32>,
    } else {
    }
    return
  }
  func.func @transform_0(%arg0: i32, %arg1: i32) -> (i32, i32) {
    %c0_i32 = arith.constant 0 : i32
    return %arg0, %arg1 : i32, i32
  }
  func.func @transform_1(%arg0: i32, %arg1: i32) -> (i32, i32) {
    %c0_i32 = arith.constant 0 : i32
    %c0_i32_0 = arith.constant 0 : i32
    return %arg1, %c0_i32 : i32, i32
  }
  func.func @transform_2(%arg0: i32, %arg1: i32) -> (i32, i32) {
    %c0_i32 = arith.constant 0 : i32
    %c0_i32_0 = arith.constant 0 : i32
    %c0_i32_1 = arith.constant 0 : i32
    return %c0_i32, %c0_i32_0 : i32, i32
  }
  func.func @transform_3(%arg0: i32, %arg1: i32) -> (i32, i32) {
    %c0_i32 = arith.constant 0 : i32
    %c0_i32_0 = arith.constant 0 : i32
    %c0_i32_1 = arith.constant 0 : i32
    return %c0_i32, %c0_i32_0 : i32, i32
  }
  func.func @transform_4(%arg0: i32, %arg1: i32) -> (i32, i32) {
    %c0_i32 = arith.constant 0 : i32
    %c0_i32_0 = arith.constant 0 : i32
    %c0_i32_1 = arith.constant 0 : i32
    return %c0_i32, %c0_i32_0 : i32, i32
  }
  func.func @transform_5(%arg0: i32, %arg1: i32) -> (i32, i32) {
    %c0_i32 = arith.constant 0 : i32
    %c0_i32_0 = arith.constant 0 : i32
    %c0_i32_1 = arith.constant 0 : i32
    return %c0_i32, %c0_i32_0 : i32, i32
  }
  func.func @transform_6(%arg0: i32, %arg1: i32) -> (i32, i32) {
    %c0_i32 = arith.constant 0 : i32
    %c0_i32_0 = arith.constant 0 : i32
    %c0_i32_1 = arith.constant 0 : i32
    return %c0_i32, %c0_i32_0 : i32, i32
  }
  func.func @transform_7(%arg0: i32, %arg1: i32) -> (i32, i32) {
    %c0_i32 = arith.constant 0 : i32
    %c0_i32_0 = arith.constant 0 : i32
    return %arg0, %c0_i32 : i32, i32
  }
}

</mosaic_0001>

<bundles_post_ra>
// kernel: tpu_custom_call.1
= control target key start
LH: loop header
LB: loop body
LE: loop exit
PB: predicated region body
PF: predicated region fallthrough
CT: control target
= control target key end

     0   :  { %s3851_s0 = inlined_call_operand.hbm [shape: f32[2,1024], index: 0, kind: input, shape index: {}]   ;;  %s3852_s1 = inlined_call_operand.hbm [shape: bf16[1024,512], index: 1, kind: input, shape index: {}]   ;;  %s3853_s2 = inlined_call_operand.vmem [shape: f32[1,512], index: 2, kind: input, shape index: {}]   ;;  %s3854_s3 = inlined_call_operand.hbm [shape: bf16[512,256], index: 3, kind: input, shape index: {}]   ;;  %s3855_s4 = inlined_call_operand.vmem [shape: f32[1,256], index: 4, kind: input, shape index: {}]   ;;  %s3856_s5 = inlined_call_operand.vmem [shape: f32[1,256], index: 5, kind: input, shape index: {}]   ;;  %s3857_s6 = inlined_call_operand.<no memory space> [shape: f32[1,1], index: 6, kind: input, shape index: {}]   ;;  %s3858_s7 = inlined_call_operand.hbm [shape: f32[1,8], index: 7, kind: output, shape index: {}]  }
   0x1   :  { %v12_v0 = vstv %s3857_s6 }
   0x2   :  { %13 = vst [vmem:[#allocation3] sm:$0x1] %v12_v0 }
   0x3   :  { %14 = vsyncpa [#allocation5], 0 }
   0x4   :  { %15 = vsyncpa [#allocation8], 0 }
   0x5   :  { %16 = vsyncpa [#allocation6], 0 }
   0x6   :  { %21 = vsyncadd [#allocation5], 768  ;;  %s3629_s26 = smov [#allocation7]   ;;  %s3630_s28 = smov [#allocation4]  }
   0x7   :  { %s34_s27 = sshll.u32 %s3629_s26, 4  ;;  %s22_s29 = sshll.u32 %s3630_s28, 4  ;;  %s35_s27 = int_to_ptr.vmem [resolvable:$true] %s34_s27  ;;  %s3682_s29 = int_to_ptr.vmem [resolvable:$true] %s22_s29 }
   0x8   :  { %s3535_s9 = scalar_lea.hbm %s3852_s1, 32768 }
   0x9   :  { %p3536_p0 = scmp.ne.s32.totalorder %s3852_s1, %s3535_s9  ;;  %p3539_p1 = scmp.lt.u32.totalorder %s3535_s9, %s3852_s1 }
   0xb   :  { %p3541_p2 = pnand %p3539_p1, %p3536_p0 }
   0xd   :  { %3544 = shalt.err (!%p3541_p2)
}
   0xe   :  { %s3545_s13 = scalar_lea.vmem %s35_s27, 32768  ;;  %p3550_p4 = scmp.lt.s32.totalorder %s35_s27, %s35_s27 }
   0xf   :  { %p3546_p3 = scmp.ne.s32.totalorder %s35_s27, %s3545_s13  ;;  %p3551_p5 = scmp.lt.s32.totalorder %s3545_s13, %s3545_s13 }
  0x11   :  { %p3552_p6 = por %p3551_p5, %p3550_p4 }
  0x13   :  { %p3553_p7 = pnand %p3552_p6, %p3546_p3 }
  0x15   :  { %3556 = shalt.err (!%p3553_p7)
}
  0x16   :  { %s3631_s14 = smov 256   ;;  %s3632_s15 = smov 16  }
  0x17   :  { %40 = dma.hbm_to_vmem [thread:$0]  %s3852_s1, 32768, %s35_s27, [#allocation8], %s3631_s14, %s3631_s14, %s3632_s15  }
  0x18   :  { %s3557_s20 = scalar_lea.hbm %s3851_s0, 256 }
  0x19   :  { %p3558_p8 = scmp.ne.s32.totalorder %s3851_s0, %s3557_s20  ;;  %p3561_p9 = scmp.lt.u32.totalorder %s3557_s20, %s3851_s0 }
  0x1b   :  { %p3563_p10 = pnand %p3561_p9, %p3558_p8 }
  0x1d   :  { %3566 = shalt.err (!%p3563_p10)
}
  0x1e   :  { %s3567_s25 = scalar_lea.vmem %s3682_s29, 256  ;;  %s3571_s1 = scalar_lea.vmem %s3682_s29, 1024 }
  0x1f   :  { %p3568_p11 = scmp.ne.s32.totalorder %s3682_s29, %s3567_s25  ;;  %p3572_p12 = scmp.lt.s32.totalorder %s3682_s29, %s3682_s29 }
  0x20   :  { %p3573_p13 = scmp.lt.s32.totalorder %s3571_s1, %s3567_s25 }
  0x22   :  { %p3574_p0 = por %p3573_p13, %p3572_p12 }
  0x24   :  { %p3575_p1 = pnand %p3574_p0, %p3568_p11 }
  0x26   :  { %3578 = shalt.err (!%p3575_p1)
}
  0x27   :  { %28 = dma.hbm_to_vmem [thread:$0]  %s3851_s0, 256, %s3682_s29, [#allocation5], %s3631_s14, %s3631_s14, %s3632_s15  }
  0x28   :  { %s3633_s28 = smov [#allocation9]   ;;  %s3579_s10 = scalar_lea.hbm %s3854_s3, 8192 }
  0x29   :  { %s48_s30 = sshll.u32 %s3633_s28, 4  ;;  %p3580_p2 = scmp.ne.s32.totalorder %s3854_s3, %s3579_s10  ;;  %s49_s30 = int_to_ptr.vmem [resolvable:$true] %s48_s30 }
  0x2a   :  { %p3583_p3 = scmp.lt.u32.totalorder %s3579_s10, %s3854_s3 }
  0x2c   :  { %p3585_p4 = pnand %p3583_p3, %p3580_p2 }
  0x2e   :  { %3588 = shalt.err (!%p3585_p4)
}
  0x2f   :  { %s3589_s16 = scalar_lea.vmem %s49_s30, 8192  ;;  %p3594_p6 = scmp.lt.s32.totalorder %s49_s30, %s49_s30 }
  0x30   :  { %p3590_p5 = scmp.ne.s32.totalorder %s49_s30, %s3589_s16  ;;  %p3595_p7 = scmp.lt.s32.totalorder %s3589_s16, %s3589_s16 }
  0x32   :  { %p3596_p8 = por %p3595_p7, %p3594_p6 }
  0x34   :  { %p3597_p9 = pnand %p3596_p8, %p3590_p5 }
  0x36   :  { %3600 = shalt.err (!%p3597_p9)
}
  0x37   :  { %s3634_s0 = smov 128   ;;  %s3635_s29 = smov 8  }
  0x38   :  { %54 = dma.hbm_to_vmem [thread:$0]  %s3854_s3, 8192, %s49_s30, [#allocation8], %s3634_s0, %s3634_s0, %s3635_s29  }
  0x39   :  { %3623 = dma.done.wait [#allocation5], 1024  }
  0x3a   :  { %3624 = vsyncadd [#allocation5], 4294966272 }
  0x3b   :  { %3625 = dma.done.wait [#allocation8], 40960  }
  0x3c   :  { %3626 = vsyncadd [#allocation8], 4294926336  ;;  %v3039_v1 = vld [vmem:[#allocation7 + $0x4] ss:$16 sps:$4 sm:$0xff]   ;;  %v3041_v2 = vld [vmem:[#allocation7] ss:$16 sps:$4 sm:$0xff]   ;;  %v105_v12 = vlaneseq }
  0x3d   :  { %1722 = vmatprep.subr.bf16.mxu1 %v3039_v1  ;;  %v3042_v3 = vld [vmem:[#allocation7 + $0x24] ss:$16 sps:$4 sm:$0xff]   ;;  %v3044_v4 = vld [vmem:[#allocation7 + $0x20] ss:$16 sps:$4 sm:$0xff]   ;;  %v3636_v10 = vmov 1983009808  }
  0x3e   :  { %1723 = vmatpush1.bf16.msra.mxu1 %v3041_v2  ;;  %v3045_v5 = vld [vmem:[#allocation7 + $0x44] ss:$16 sps:$4 sm:$0xff]   ;;  %v3047_v6 = vld [vmem:[#allocation7 + $0x40] ss:$16 sps:$4 sm:$0xff]   ;;  %v103_v11 = vunpack.c.l.s4 %v3636_v10  ;;  %v3726_v16 = vshrl.u32 %v105_v12, 7  ;;  %vm2683_vm0 = vcmask 57344  }
  0x3f   :  { %1724 = vmatprep.subr.bf16.mxu1 %v3042_v3  ;;  %v3048_v7 = vld [vmem:[#allocation7 + $0x64] ss:$16 sps:$4 sm:$0xff]   ;;  %v3050_v8 = vld [vmem:[#allocation7 + $0x60] ss:$16 sps:$4 sm:$0xff]  }
  0x40   :  { %v3051_v9 = vld [vmem:[#allocation7 + $0x84] ss:$16 sps:$4 sm:$0xff]   ;;  %v3053_v13 = vld [vmem:[#allocation7 + $0x80] ss:$16 sps:$4 sm:$0xff]   ;;  %v104_v15 = vunpack.c.0.s8 %v103_v11 }
  0x41   :  { %v3054_v14 = vld [vmem:[#allocation7 + $0xa4] ss:$16 sps:$4 sm:$0xff]   ;;  %v3056_v17 = vld [vmem:[#allocation7 + $0xa0] ss:$16 sps:$4 sm:$0xff]  }
  0x42   :  { %1725 = vmatpush1.bf16.msra.mxu1 %v3044_v4  ;;  %v3057_v18 = vld [vmem:[#allocation7 + $0xc4] ss:$16 sps:$4 sm:$0xff]   ;;  %v3729_v19 = vsub.s32 %v104_v15, %v3726_v16  ;;  %v3059_v20 = vld [vmem:[#allocation7 + $0xc0] ss:$16 sps:$4 sm:$0xff]  }
  0x43   :  { %1726 = vmatprep.subr.bf16.mxu1 %v3045_v5  ;;  %v3087_v21 = vld [vmem:[#allocation4] ss:$16 sps:$4 sm:$0xff]   ;;  %v3089_v22 = vld [vmem:[#allocation4 + $0x4] ss:$16 sps:$4 sm:$0xff]  }
  0x44   :  { %v3090_v23 = vld [vmem:[#allocation4 + $0x20] ss:$16 sps:$4 sm:$0xff]   ;;  %v3092_v24 = vld [vmem:[#allocation4 + $0x24] ss:$16 sps:$4 sm:$0xff]   ;;  %v3732_v26 = vrot.slane %v3087_v21, %v3729_v19  ;;  %v3738_v28 = vrot.slane %v3089_v22, %v3729_v19  ;;  %v3192_v22 = vld [vmem:[#allocation4 + $0x8] ss:$16 sps:$4 sm:$0xff]  }
  0x45   :  { %v3060_v25 = vld [vmem:[#allocation7 + $0xe4] ss:$16 sps:$4 sm:$0xff]   ;;  %v3735_v27 = vrot.slane %v3090_v23, %v3729_v19  ;;  %v3741_v29 = vrot.slane %v3092_v24, %v3729_v19  ;;  %v3098_v31 = vld [vmem:[#allocation7 + $0x400] ss:$16 sps:$4 sm:$0xff]   ;;  %v3194_v23 = vld [vmem:[#allocation4 + $0xc] ss:$16 sps:$4 sm:$0xff]  }
  0x46   :  { %1727 = vmatpush1.bf16.msra.mxu1 %v3047_v6  ;;  %v3096_v30 = vld [vmem:[#allocation7 + $0x404] ss:$16 sps:$4 sm:$0xff]   ;;  %v3062_v32 = vld [vmem:[#allocation7 + $0xe0] ss:$16 sps:$4 sm:$0xff]   ;;  %v3195_v24 = vld [vmem:[#allocation4 + $0x28] ss:$16 sps:$4 sm:$0xff]  }
  0x47   :  { %1728 = vmatprep.subr.bf16.mxu1 %v3048_v7  ;;  %v3063_v33 = vld [vmem:[#allocation7 + $0x104] ss:$16 sps:$4 sm:$0xff]   ;;  %v131_v34 = vcombine.high %v3732_v26, %v3735_v27  ;;  %v3747_v35 = vcombine.low %v3738_v28, %v3741_v29  ;;  %1804 = vmatprep.subr.bf16.mxu0 %v3096_v30  ;;  %v3104_v38 = vld [vmem:[#allocation7 + $0x420] ss:$16 sps:$4 sm:$0xff]   ;;  %v130_v3 = vcombine.low %v3732_v26, %v3735_v27 }
  0x48   :  { %v3102_v36 = vld [vmem:[#allocation7 + $0x424] ss:$16 sps:$4 sm:$0xff]   ;;  %1805 = vmatpush1.bf16.msra.mxu0 %v3098_v31  ;;  %v3065_v39 = vld [vmem:[#allocation7 + $0x100] ss:$16 sps:$4 sm:$0xff]   ;;  %v133_v6 = vcombine.high %v3738_v28, %v3741_v29  ;;  %v144_v27 = vrot.slane %v3192_v22, %v3729_v19  ;;  %v3764_v28 = vrot.slane %v3194_v23, %v3729_v19  ;;  %v158_v30 = vrot.slane %v3195_v24, %v3729_v19  ;;  %v3248_v22 = vld [vmem:[#allocation7 + $0x10c] ss:$16 sps:$4 sm:$0xff]  }
  0x49   :  { %v3749_v37 = vpack.c.bf16 %v131_v34, %v131_v34  ;;  %1806 = vmatprep.subr.bf16.mxu0 %v3102_v36  ;;  %v3108_v40 = vld [vmem:[#allocation7 + $0x444] ss:$16 sps:$4 sm:$0xff]   ;;  %v3110_v42 = vld [vmem:[#allocation7 + $0x440] ss:$16 sps:$4 sm:$0xff]  }
  0x4a   :  { %1729 = vmatpush1.bf16.msra.mxu1 %v3050_v8  ;;  %v3066_v41 = vld [vmem:[#allocation7 + $0x124] ss:$16 sps:$4 sm:$0xff]   ;;  %v3068_v44 = vld [vmem:[#allocation7 + $0x120] ss:$16 sps:$4 sm:$0xff]   ;;  %v3758_v12 = vpack.c.bf16 %v133_v6, %v133_v6  ;;  %v167_v34 = vcombine.high %v144_v27, %v158_v30  ;;  %v3230_v6 = vld [vmem:[#allocation7 + $0xac] ss:$16 sps:$4 sm:$0xff]  }
  0x4b   :  { %1730 = vmatprep.subr.bf16.mxu1 %v3051_v9  ;;  %1754 = vmatprep.mubr.bf16.mxu1 %v3749_v37  ;;  %v3114_v43 = vld [vmem:[#allocation7 + $0x464] ss:$16 sps:$4 sm:$0xff]   ;;  %v3116_v46 = vld [vmem:[#allocation7 + $0x460] ss:$16 sps:$4 sm:$0xff]   ;;  %v3756_v9 = vpack.c.bf16 %v130_v3, %v130_v3  ;;  %v3224_v3 = vld [vmem:[#allocation7 + $0x8c] ss:$16 sps:$4 sm:$0xff]  }
  0x4c   :  { %1807 = vmatpush1.bf16.msra.mxu0 %v3104_v38  ;;  %v3069_v45 = vld [vmem:[#allocation7 + $0x144] ss:$16 sps:$4 sm:$0xff]   ;;  %v3071_v48 = vld [vmem:[#allocation7 + $0x140] ss:$16 sps:$4 sm:$0xff]  }
  0x4d   :  { %1808 = vmatprep.subr.bf16.mxu0 %v3108_v40  ;;  %v3120_v47 = vld [vmem:[#allocation7 + $0x484] ss:$16 sps:$4 sm:$0xff]   ;;  %v3122_v50 = vld [vmem:[#allocation7 + $0x480] ss:$16 sps:$4 sm:$0xff]   ;;  %v3774_v40 = vpack.c.bf16 %v167_v34, %v167_v34  ;;  %v3260_v34 = vld [vmem:[#allocation7 + $0x14c] ss:$16 sps:$4 sm:$0xff]  }
  0x4e   :  { %1731 = vmatpush1.bf16.msra.mxu1 %v3053_v13  ;;  %v3072_v49 = vld [vmem:[#allocation7 + $0x164] ss:$16 sps:$4 sm:$0xff]   ;;  %v3074_v52 = vld [vmem:[#allocation7 + $0x160] ss:$16 sps:$4 sm:$0xff]  }
  0x4f   :  { %1732 = vmatprep.subr.bf16.mxu1 %v3054_v14  ;;  %v3126_v51 = vld [vmem:[#allocation7 + $0x4a4] ss:$16 sps:$4 sm:$0xff]   ;;  %v3128_v54 = vld [vmem:[#allocation7 + $0x4a0] ss:$16 sps:$4 sm:$0xff]   ;;  %1836 = vmatprep.mubr.bf16.mxu0 %v3774_v40 }
  0x50   :  { %1809 = vmatpush1.bf16.msra.mxu0 %v3110_v42  ;;  %v3075_v53 = vld [vmem:[#allocation7 + $0x184] ss:$16 sps:$4 sm:$0xff]   ;;  %v3077_v56 = vld [vmem:[#allocation7 + $0x180] ss:$16 sps:$4 sm:$0xff]  }
  0x51   :  { %1810 = vmatprep.subr.bf16.mxu0 %v3114_v43  ;;  %v3132_v55 = vld [vmem:[#allocation7 + $0x4c4] ss:$16 sps:$4 sm:$0xff]   ;;  %v3134_v58 = vld [vmem:[#allocation7 + $0x4c0] ss:$16 sps:$4 sm:$0xff]  }
  0x52   :  { %1733 = vmatpush1.bf16.msra.mxu1 %v3056_v17  ;;  %v3078_v57 = vld [vmem:[#allocation7 + $0x1a4] ss:$16 sps:$4 sm:$0xff]   ;;  %v3080_v60 = vld [vmem:[#allocation7 + $0x1a0] ss:$16 sps:$4 sm:$0xff]  }
  0x53   :  { %1734 = vmatprep.subr.bf16.mxu1 %v3057_v18  ;;  %v3138_v59 = vld [vmem:[#allocation7 + $0x4e4] ss:$16 sps:$4 sm:$0xff]   ;;  %v3140_v62 = vld [vmem:[#allocation7 + $0x4e0] ss:$16 sps:$4 sm:$0xff]  }
  0x54   :  { %1811 = vmatpush1.bf16.msra.mxu0 %v3116_v46  ;;  %v3081_v61 = vld [vmem:[#allocation7 + $0x1c4] ss:$16 sps:$4 sm:$0xff]   ;;  %v3083_v0 = vld [vmem:[#allocation7 + $0x1c0] ss:$16 sps:$4 sm:$0xff]  }
  0x55   :  { %1812 = vmatprep.subr.bf16.mxu0 %v3120_v47  ;;  %v3144_v63 = vld [vmem:[#allocation7 + $0x504] ss:$16 sps:$4 sm:$0xff]   ;;  %v3146_v2 = vld [vmem:[#allocation7 + $0x500] ss:$16 sps:$4 sm:$0xff]  }
  0x56   :  { %1735 = vmatpush1.bf16.msra.mxu1 %v3059_v20  ;;  %v3084_v1 = vld [vmem:[#allocation7 + $0x1e4] ss:$16 sps:$4 sm:$0xff]   ;;  %v3086_v5 = vld [vmem:[#allocation7 + $0x1e0] ss:$16 sps:$4 sm:$0xff]  }
  0x57   :  { %1736 = vmatprep.subr.bf16.mxu1 %v3060_v25  ;;  %v3150_v4 = vld [vmem:[#allocation7 + $0x524] ss:$16 sps:$4 sm:$0xff]   ;;  %v3152_v8 = vld [vmem:[#allocation7 + $0x520] ss:$16 sps:$4 sm:$0xff]   ;;  %v3197_v25 = vld [vmem:[#allocation4 + $0x2c] ss:$16 sps:$4 sm:$0xff]  }
  0x58   :  { %1813 = vmatpush1.bf16.msra.mxu0 %v3122_v50  ;;  %v3095_v7 = vld [vmem:[#allocation7 + $0x204] ss:$16 sps:$4 sm:$0xff]   ;;  %v3093_v11 = vld [vmem:[#allocation7 + $0x200] ss:$16 sps:$4 sm:$0xff]   ;;  %v3768_v31 = vrot.slane %v3197_v25, %v3729_v19  ;;  %v3200_v50 = vld [vmem:[#allocation7 + $0xc] ss:$16 sps:$4 sm:$0xff]  }
  0x59   :  { %1814 = vmatprep.subr.bf16.mxu0 %v3126_v51  ;;  %v3156_v10 = vld [vmem:[#allocation7 + $0x544] ss:$16 sps:$4 sm:$0xff]   ;;  %v3158_v14 = vld [vmem:[#allocation7 + $0x540] ss:$16 sps:$4 sm:$0xff]   ;;  %v3246_v25 = vld [vmem:[#allocation7 + $0x108] ss:$16 sps:$4 sm:$0xff]  }
  0x5a   :  { %1737 = vmatpush1.bf16.msra.mxu1 %v3062_v32  ;;  %v3101_v13 = vld [vmem:[#allocation7 + $0x224] ss:$16 sps:$4 sm:$0xff]   ;;  %v3099_v15 = vld [vmem:[#allocation7 + $0x220] ss:$16 sps:$4 sm:$0xff]   ;;  %v3772_v36 = vcombine.low %v3764_v28, %v3768_v31 }
  0x5b   :  { %1738 = vmatprep.subr.bf16.mxu1 %v3063_v33  ;;  %v3162_v17 = vld [vmem:[#allocation7 + $0x564] ss:$16 sps:$4 sm:$0xff]   ;;  %v3164_v20 = vld [vmem:[#allocation7 + $0x560] ss:$16 sps:$4 sm:$0xff]  }
  0x5c   :  { %1815 = vmatpush1.bf16.msra.mxu0 %v3128_v54  ;;  %v3107_v18 = vld [vmem:[#allocation7 + $0x244] ss:$16 sps:$4 sm:$0xff]   ;;  %v3105_v26 = vld [vmem:[#allocation7 + $0x240] ss:$16 sps:$4 sm:$0xff]   ;;  %v3198_v54 = vld [vmem:[#allocation7 + $0x8] ss:$16 sps:$4 sm:$0xff]  }
  0x5d   :  { %1816 = vmatprep.subr.bf16.mxu0 %v3132_v55  ;;  %v3168_v21 = vld [vmem:[#allocation7 + $0x584] ss:$16 sps:$4 sm:$0xff]   ;;  %v3170_v32 = vld [vmem:[#allocation7 + $0x580] ss:$16 sps:$4 sm:$0xff]   ;;  %v3206_v55 = vld [vmem:[#allocation7 + $0x2c] ss:$16 sps:$4 sm:$0xff]  }
  0x5e   :  { %1739 = vmatpush1.bf16.msra.mxu1 %v3065_v39  ;;  %v3113_v29 = vld [vmem:[#allocation7 + $0x264] ss:$16 sps:$4 sm:$0xff]   ;;  %v3111_v38 = vld [vmem:[#allocation7 + $0x260] ss:$16 sps:$4 sm:$0xff]  }
  0x5f   :  { %1740 = vmatprep.subr.bf16.mxu1 %v3066_v41  ;;  %v3174_v33 = vld [vmem:[#allocation7 + $0x5a4] ss:$16 sps:$4 sm:$0xff]   ;;  %v3176_v41 = vld [vmem:[#allocation7 + $0x5a0] ss:$16 sps:$4 sm:$0xff]  }
  0x60   :  { %1817 = vmatpush1.bf16.msra.mxu0 %v3134_v58  ;;  %v3119_v39 = vld [vmem:[#allocation7 + $0x284] ss:$16 sps:$4 sm:$0xff]   ;;  %v3117_v42 = vld [vmem:[#allocation7 + $0x280] ss:$16 sps:$4 sm:$0xff]   ;;  %v3204_v58 = vld [vmem:[#allocation7 + $0x28] ss:$16 sps:$4 sm:$0xff]  }
  0x61   :  { %1818 = vmatprep.subr.bf16.mxu0 %v3138_v59  ;;  %v3180_v19 = vld [vmem:[#allocation7 + $0x5c4] ss:$16 sps:$4 sm:$0xff]   ;;  %v3123_v46 = vld [vmem:[#allocation7 + $0x2a0] ss:$16 sps:$4 sm:$0xff]   ;;  %v3212_v59 = vld [vmem:[#allocation7 + $0x4c] ss:$16 sps:$4 sm:$0xff]  }
  0x62   :  { %1741 = vmatpush1.bf16.msra.mxu1 %v3068_v44  ;;  %v3125_v43 = vld [vmem:[#allocation7 + $0x2a4] ss:$16 sps:$4 sm:$0xff]   ;;  %v3182_v44 = vld [vmem:[#allocation7 + $0x5c0] ss:$16 sps:$4 sm:$0xff]  }
  0x63   :  { %1742 = vmatprep.subr.bf16.mxu1 %v3069_v45  ;;  %v3186_v45 = vld [vmem:[#allocation7 + $0x5e4] ss:$16 sps:$4 sm:$0xff]   ;;  %v3129_v51 = vld [vmem:[#allocation7 + $0x2c0] ss:$16 sps:$4 sm:$0xff]  }
  0x64   :  { %1819 = vmatpush1.bf16.msra.mxu0 %v3140_v62  ;;  %v3131_v47 = vld [vmem:[#allocation7 + $0x2c4] ss:$16 sps:$4 sm:$0xff]   ;;  %v3210_v62 = vld [vmem:[#allocation7 + $0x48] ss:$16 sps:$4 sm:$0xff]   ;;  %v3177_v23 = vld [vmem:[#allocation7 + $0x3c0] ss:$16 sps:$4 sm:$0xff]  }
  0x65   :  { %1820 = vmatprep.subr.bf16.mxu0 %v3144_v63  ;;  %v3218_v63 = vld [vmem:[#allocation7 + $0x6c] ss:$16 sps:$4 sm:$0xff]   ;;  %v3185_v24 = vld [vmem:[#allocation7 + $0x3e4] ss:$16 sps:$4 sm:$0xff]  }
  0x66   :  { %1743 = vmatpush1.bf16.msra.mxu1 %v3071_v48  ;;  %v166_v48 = vcombine.low %v144_v27, %v158_v30  ;;  %v3183_v27 = vld [vmem:[#allocation7 + $0x3e0] ss:$16 sps:$4 sm:$0xff]   ;;  %v3191_v30 = vld [vmem:[#allocation7 + $0x604] ss:$16 sps:$4 sm:$0xff]  }
  0x67   :  { %1744 = vmatprep.subr.bf16.mxu1 %v3072_v49  ;;  %v3188_v49 = vld [vmem:[#allocation7 + $0x5e0] ss:$16 sps:$4 sm:$0xff]  }
  0x68   :  { %1821 = vmatpush1.bf16.msra.mxu0 %v3146_v2  ;;  %v3216_v2 = vld [vmem:[#allocation7 + $0x68] ss:$16 sps:$4 sm:$0xff]  }
  0x69   :  { %1822 = vmatprep.subr.bf16.mxu0 %v3150_v4  ;;  %v3161_v4 = vld [vmem:[#allocation7 + $0x364] ss:$16 sps:$4 sm:$0xff]  }
  0x6a   :  { %1745 = vmatpush1.bf16.msra.mxu1 %v3074_v52  ;;  %v3137_v52 = vld [vmem:[#allocation7 + $0x2e4] ss:$16 sps:$4 sm:$0xff]  }
  0x6b   :  { %1746 = vmatprep.subr.bf16.mxu1 %v3075_v53  ;;  %v3777_v53 = vpack.c.bf16 %v166_v48, %v166_v48  ;;  %v3213_v48 = vld [vmem:[#allocation7 + $0x660] ss:$16 sps:$4 sm:$0xff]  }
  0x6c   :  { %1823 = vmatpush1.bf16.msra.mxu0 %v3152_v8  ;;  %v3167_v8 = vld [vmem:[#allocation7 + $0x384] ss:$16 sps:$4 sm:$0xff]  }
  0x6d   :  { %1824 = vmatprep.subr.bf16.mxu0 %v3156_v10  ;;  %v3228_v10 = vld [vmem:[#allocation7 + $0xa8] ss:$16 sps:$4 sm:$0xff]  }
  0x6e   :  { %1747 = vmatpush1.bf16.msra.mxu1 %v3077_v56  ;;  %v3135_v56 = vld [vmem:[#allocation7 + $0x2e0] ss:$16 sps:$4 sm:$0xff]  }
  0x6f   :  { %1748 = vmatprep.subr.bf16.mxu1 %v3078_v57  ;;  %v3143_v57 = vld [vmem:[#allocation7 + $0x304] ss:$16 sps:$4 sm:$0xff]  }
  0x70   :  { %1825 = vmatpush1.bf16.msra.mxu0 %v3158_v14  ;;  %v3173_v14 = vld [vmem:[#allocation7 + $0x3a4] ss:$16 sps:$4 sm:$0xff]  }
  0x71   :  { %1826 = vmatprep.subr.bf16.mxu0 %v3162_v17  ;;  %v3242_v17 = vld [vmem:[#allocation7 + $0xec] ss:$16 sps:$4 sm:$0xff]  }
  0x72   :  { %1749 = vmatpush1.bf16.msra.mxu1 %v3080_v60  ;;  %v3141_v60 = vld [vmem:[#allocation7 + $0x300] ss:$16 sps:$4 sm:$0xff]  }
  0x73   :  { %1750 = vmatprep.subr.bf16.mxu1 %v3081_v61  ;;  %v3149_v61 = vld [vmem:[#allocation7 + $0x324] ss:$16 sps:$4 sm:$0xff]  }
  0x74   :  { %1827 = vmatpush1.bf16.msra.mxu0 %v3164_v20  ;;  %v3179_v20 = vld [vmem:[#allocation7 + $0x3c4] ss:$16 sps:$4 sm:$0xff]  }
  0x75   :  { %1828 = vmatprep.subr.bf16.mxu0 %v3168_v21  ;;  %v3240_v21 = vld [vmem:[#allocation7 + $0xe8] ss:$16 sps:$4 sm:$0xff]  }
  0x76   :  { %1751 = vmatpush1.bf16.msra.mxu1 %v3083_v0  ;;  %v3147_v0 = vld [vmem:[#allocation7 + $0x320] ss:$16 sps:$4 sm:$0xff]  }
  0x77   :  { %1752 = vmatprep.subr.bf16.mxu1 %v3084_v1  ;;  %v3155_v1 = vld [vmem:[#allocation7 + $0x344] ss:$16 sps:$4 sm:$0xff]  }
  0x78   :  { %1829 = vmatpush1.bf16.msra.mxu0 %v3170_v32  ;;  %v3252_v32 = vld [vmem:[#allocation7 + $0x128] ss:$16 sps:$4 sm:$0xff]  }
  0x79   :  { %1830 = vmatprep.subr.bf16.mxu0 %v3174_v33  ;;  %v3785_v33 = vpack.c.bf16 %v3747_v35, %v3747_v35  ;;  %v3209_v35 = vld [vmem:[#allocation7 + $0x644] ss:$16 sps:$4 sm:$0xff]  }
  0x7a   :  { %1753 = vmatpush1.bf16.msra.mxu1 %v3086_v5  ;;  %v3222_v5 = vld [vmem:[#allocation7 + $0x88] ss:$16 sps:$4 sm:$0xff]  }
  0x7b   :  { %1763 = vmatprep.subr.bf16.mxu1 %v3095_v7  ;;  %v3159_v7 = vld [vmem:[#allocation7 + $0x360] ss:$16 sps:$4 sm:$0xff]  }
  0x7c   :  { %1831 = vmatpush1.bf16.msra.mxu0 %v3176_v41  ;;  %v3203_v41 = vld [vmem:[#allocation7 + $0x624] ss:$16 sps:$4 sm:$0xff]  }
  0x7d   :  { %1755 = vmatmul.mubr.bf16.vlgmr.msra.gmra.mrb[0].mxu1 %v3756_v9  ;;  %1832 = vmatprep.subr.bf16.mxu0 %v3180_v19  ;;  %v3258_v19 = vld [vmem:[#allocation7 + $0x148] ss:$16 sps:$4 sm:$0xff]  }
  0x7e   :  { %1764 = vmatpush1.bf16.msra.mxu1 %v3093_v11  ;;  %1795 = vmatprep.mubr.bf16.mxu1 %v3758_v12  ;;  %v3236_v11 = vld [vmem:[#allocation7 + $0xcc] ss:$16 sps:$4 sm:$0xff]  }
  0x7f   :  { %1765 = vmatprep.subr.bf16.mxu1 %v3101_v13  ;;  %v3165_v13 = vld [vmem:[#allocation7 + $0x380] ss:$16 sps:$4 sm:$0xff]  }
  0x80   :  { %1833 = vmatpush1.bf16.msra.mxu0 %v3182_v44  ;;  %v3207_v44 = vld [vmem:[#allocation7 + $0x640] ss:$16 sps:$4 sm:$0xff]  }
  0x81   :  { %1834 = vmatprep.subr.bf16.mxu0 %v3186_v45  ;;  %v3215_v45 = vld [vmem:[#allocation7 + $0x664] ss:$16 sps:$4 sm:$0xff]  }
  0x82   :  { %1766 = vmatpush1.bf16.msra.mxu1 %v3099_v15  ;;  %v3234_v15 = vld [vmem:[#allocation7 + $0xc8] ss:$16 sps:$4 sm:$0xff]  }
  0x83   :  { %1767 = vmatprep.subr.bf16.mxu1 %v3107_v18  ;;  %v3171_v18 = vld [vmem:[#allocation7 + $0x3a0] ss:$16 sps:$4 sm:$0xff]  }
  0x84   :  { %1835 = vmatpush1.bf16.msra.mxu0 %v3188_v49  ;;  %v3221_v49 = vld [vmem:[#allocation7 + $0x684] ss:$16 sps:$4 sm:$0xff]  }
  0x85   :  { %1886 = vmatprep.subr.bf16.mxu0 %v3200_v50  ;;  %v3276_v50 = vld [vmem:[#allocation7 + $0x1a8] ss:$16 sps:$4 sm:$0xff]  }
  0x86   :  { %1768 = vmatpush1.bf16.msra.mxu1 %v3105_v26  ;;  %v3254_v26 = vld [vmem:[#allocation7 + $0x12c] ss:$16 sps:$4 sm:$0xff]  }
  0x87   :  { %1769 = vmatprep.subr.bf16.mxu1 %v3113_v29  ;;  %1837 = vmatmul.mubr.bf16.vlgmr.msra.gmra.mrb[0].mxu0 %v3777_v53  ;;  %v169_v29 = vcombine.high %v3764_v28, %v3768_v31  ;;  %v3266_v28 = vld [vmem:[#allocation7 + $0x16c] ss:$16 sps:$4 sm:$0xff]   ;;  %v3201_v31 = vld [vmem:[#allocation7 + $0x620] ss:$16 sps:$4 sm:$0xff]  }
  0x88   :  { %1887 = vmatpush1.bf16.msra.mxu0 %v3198_v54  ;;  %1918 = vmatprep.mubr.bf16.mxu0 %v3749_v37  ;;  %v3153_v37 = vld [vmem:[#allocation7 + $0x340] ss:$16 sps:$4 sm:$0xff]   ;;  %v3227_v54 = vld [vmem:[#allocation7 + $0x6a4] ss:$16 sps:$4 sm:$0xff]  }
  0x89   :  { %1888 = vmatprep.subr.bf16.mxu0 %v3206_v55  ;;  %v3282_v55 = vld [vmem:[#allocation7 + $0x1c8] ss:$16 sps:$4 sm:$0xff]  }
  0x8a   :  { %1770 = vmatpush1.bf16.msra.mxu1 %v3111_v38  ;;  %v3189_v38 = vld [vmem:[#allocation7 + $0x600] ss:$16 sps:$4 sm:$0xff]  }
  0x8b   :  { %1771 = vmatprep.subr.bf16.mxu1 %v3119_v39  ;;  %v3787_v39 = vpack.c.bf16 %v169_v29, %v169_v29  ;;  %v3336_v29 = vld [vmem:[#allocation7 + $0x4e8] ss:$16 sps:$4 sm:$0xff]  }
  0x8c   :  { %1889 = vmatpush1.bf16.msra.mxu0 %v3204_v58  ;;  %v3233_v58 = vld [vmem:[#allocation7 + $0x6c4] ss:$16 sps:$4 sm:$0xff]  }
  0x8d   :  { %1890 = vmatprep.subr.bf16.mxu0 %v3212_v59  ;;  %v3288_v59 = vld [vmem:[#allocation7 + $0x1e8] ss:$16 sps:$4 sm:$0xff]  }
  0x8e   :  { %1772 = vmatpush1.bf16.msra.mxu1 %v3117_v42  ;;  %v3264_v42 = vld [vmem:[#allocation7 + $0x168] ss:$16 sps:$4 sm:$0xff]  }
  0x8f   :  { %1773 = vmatprep.subr.bf16.mxu1 %v3125_v43  ;;  %v3272_v43 = vld [vmem:[#allocation7 + $0x18c] ss:$16 sps:$4 sm:$0xff]  }
  0x90   :  { %1891 = vmatpush1.bf16.msra.mxu0 %v3210_v62  ;;  %v3239_v62 = vld [vmem:[#allocation7 + $0x6e4] ss:$16 sps:$4 sm:$0xff]  }
  0x91   :  { %1892 = vmatprep.subr.bf16.mxu0 %v3218_v63  ;;  %v3294_v63 = vld [vmem:[#allocation7 + $0x408] ss:$16 sps:$4 sm:$0xff]  }
  0x92   :  { %1774 = vmatpush1.bf16.msra.mxu1 %v3123_v46  ;;  %v3270_v46 = vld [vmem:[#allocation7 + $0x188] ss:$16 sps:$4 sm:$0xff]  }
  0x93   :  { %1775 = vmatprep.subr.bf16.mxu1 %v3131_v47  ;;  %v3278_v47 = vld [vmem:[#allocation7 + $0x1ac] ss:$16 sps:$4 sm:$0xff]  }
  0x94   :  { %1893 = vmatpush1.bf16.msra.mxu0 %v3216_v2  ;;  %v3245_v2 = vld [vmem:[#allocation7 + $0x704] ss:$16 sps:$4 sm:$0xff]  }
  0x95   :  { %1894 = vmatprep.subr.bf16.mxu0 %v3224_v3  ;;  %v3300_v3 = vld [vmem:[#allocation7 + $0x428] ss:$16 sps:$4 sm:$0xff]  }
  0x96   :  { %1776 = vmatpush1.bf16.msra.mxu1 %v3129_v51  ;;  %v3284_v51 = vld [vmem:[#allocation7 + $0x1cc] ss:$16 sps:$4 sm:$0xff]  }
  0x97   :  { %1777 = vmatprep.subr.bf16.mxu1 %v3137_v52  ;;  %v3219_v52 = vld [vmem:[#allocation7 + $0x680] ss:$16 sps:$4 sm:$0xff]  }
  0x98   :  { %1895 = vmatpush1.bf16.msra.mxu0 %v3222_v5  ;;  %v3251_v5 = vld [vmem:[#allocation7 + $0x724] ss:$16 sps:$4 sm:$0xff]  }
  0x99   :  { %1896 = vmatprep.subr.bf16.mxu0 %v3230_v6  ;;  %v3306_v6 = vld [vmem:[#allocation7 + $0x448] ss:$16 sps:$4 sm:$0xff]  }
  0x9a   :  { %1778 = vmatpush1.bf16.msra.mxu1 %v3135_v56  ;;  %v3290_v56 = vld [vmem:[#allocation7 + $0x1ec] ss:$16 sps:$4 sm:$0xff]  }
  0x9b   :  { %1779 = vmatprep.subr.bf16.mxu1 %v3143_v57  ;;  %v3225_v57 = vld [vmem:[#allocation7 + $0x6a0] ss:$16 sps:$4 sm:$0xff]  }
  0x9c   :  { %1897 = vmatpush1.bf16.msra.mxu0 %v3228_v10  ;;  %v3257_v10 = vld [vmem:[#allocation7 + $0x744] ss:$16 sps:$4 sm:$0xff]  }
  0x9d   :  { %1898 = vmatprep.subr.bf16.mxu0 %v3236_v11  ;;  %v3320_v11 = vld [vmem:[#allocation7 + $0x48c] ss:$16 sps:$4 sm:$0xff]  }
  0x9e   :  { %1780 = vmatpush1.bf16.msra.mxu1 %v3141_v60  ;;  %v3296_v60 = vld [vmem:[#allocation7 + $0x40c] ss:$16 sps:$4 sm:$0xff]  }
  0x9f   :  { %1781 = vmatprep.subr.bf16.mxu1 %v3149_v61  ;;  %v3231_v61 = vld [vmem:[#allocation7 + $0x6c0] ss:$16 sps:$4 sm:$0xff]  }
  0xa0   :  { %1899 = vmatpush1.bf16.msra.mxu0 %v3234_v15  ;;  %v3261_v15 = vld [vmem:[#allocation7 + $0x760] ss:$16 sps:$4 sm:$0xff]  }
  0xa1   :  { %1900 = vmatprep.subr.bf16.mxu0 %v3242_v17  ;;  %v3326_v17 = vld [vmem:[#allocation7 + $0x4ac] ss:$16 sps:$4 sm:$0xff]  }
  0xa2   :  { %1782 = vmatpush1.bf16.msra.mxu1 %v3147_v0  ;;  %v3302_v0 = vld [vmem:[#allocation7 + $0x42c] ss:$16 sps:$4 sm:$0xff]  }
  0xa3   :  { %1783 = vmatprep.subr.bf16.mxu1 %v3155_v1  ;;  %v3237_v1 = vld [vmem:[#allocation7 + $0x6e0] ss:$16 sps:$4 sm:$0xff]  }
  0xa4   :  { %1901 = vmatpush1.bf16.msra.mxu0 %v3240_v21  ;;  %v3332_v21 = vld [vmem:[#allocation7 + $0x4cc] ss:$16 sps:$4 sm:$0xff]  }
  0xa5   :  { %1902 = vmatprep.subr.bf16.mxu0 %v3248_v22  ;;  %v3267_v22 = vld [vmem:[#allocation7 + $0x780] ss:$16 sps:$4 sm:$0xff]  }
  0xa6   :  { %1784 = vmatpush1.bf16.msra.mxu1 %v3153_v37  ;;  %v3308_v37 = vld [vmem:[#allocation7 + $0x44c] ss:$16 sps:$4 sm:$0xff]  }
  0xa7   :  { %1785 = vmatprep.subr.bf16.mxu1 %v3161_v4  ;;  %v3243_v4 = vld [vmem:[#allocation7 + $0x700] ss:$16 sps:$4 sm:$0xff]  }
  0xa8   :  { %1903 = vmatpush1.bf16.msra.mxu0 %v3246_v25  ;;  %v3338_v25 = vld [vmem:[#allocation7 + $0x4ec] ss:$16 sps:$4 sm:$0xff]  }
  0xa9   :  { %1904 = vmatprep.subr.bf16.mxu0 %v3254_v26  ;;  %v3273_v26 = vld [vmem:[#allocation7 + $0x7a0] ss:$16 sps:$4 sm:$0xff]  }
  0xaa   :  { %1786 = vmatpush1.bf16.msra.mxu1 %v3159_v7  ;;  %v3314_v7 = vld [vmem:[#allocation7 + $0x46c] ss:$16 sps:$4 sm:$0xff]  }
  0xab   :  { %1787 = vmatprep.subr.bf16.mxu1 %v3167_v8  ;;  %v3249_v8 = vld [vmem:[#allocation7 + $0x720] ss:$16 sps:$4 sm:$0xff]  }
  0xac   :  { %1905 = vmatpush1.bf16.msra.mxu0 %v3252_v32  ;;  %v3279_v32 = vld [vmem:[#allocation7 + $0x7c0] ss:$16 sps:$4 sm:$0xff]  }
  0xad   :  { %1906 = vmatprep.subr.bf16.mxu0 %v3260_v34  ;;  %v3287_v34 = vld [vmem:[#allocation7 + $0x7e4] ss:$16 sps:$4 sm:$0xff]  }
  0xae   :  { %1788 = vmatpush1.bf16.msra.mxu1 %v3165_v13  ;;  %v3263_v13 = vld [vmem:[#allocation7 + $0x764] ss:$16 sps:$4 sm:$0xff]  }
  0xaf   :  { %1789 = vmatprep.subr.bf16.mxu1 %v3173_v14  ;;  %v3318_v14 = vld [vmem:[#allocation7 + $0x488] ss:$16 sps:$4 sm:$0xff]  }
  0xb0   :  { %1907 = vmatpush1.bf16.msra.mxu0 %v3258_v19  ;;  %v3285_v19 = vld [vmem:[#allocation7 + $0x7e0] ss:$16 sps:$4 sm:$0xff]  }
  0xb1   :  { %1908 = vmatprep.subr.bf16.mxu0 %v3266_v28  ;;  %v3293_v28 = vld [vmem:[#allocation7 + $0x20c] ss:$16 sps:$4 sm:$0xff]  }
  0xb2   :  { %1790 = vmatpush1.bf16.msra.mxu1 %v3171_v18  ;;  %v3269_v18 = vld [vmem:[#allocation7 + $0x784] ss:$16 sps:$4 sm:$0xff]  }
  0xb3   :  { %1791 = vmatprep.subr.bf16.mxu1 %v3179_v20  ;;  %v3324_v20 = vld [vmem:[#allocation7 + $0x4a8] ss:$16 sps:$4 sm:$0xff]  }
  0xb4   :  { %1909 = vmatpush1.bf16.msra.mxu0 %v3264_v42  ;;  %v3291_v42 = vld [vmem:[#allocation7 + $0x208] ss:$16 sps:$4 sm:$0xff]  }
  0xb5   :  { %1910 = vmatprep.subr.bf16.mxu0 %v3272_v43  ;;  %v3795_v43 = vpack.c.bf16 %v3772_v36, %v3772_v36  ;;  %v3368_v36 = vld [vmem:[#allocation7 + $0x58c] ss:$16 sps:$4 sm:$0xff]  }
  0xb6   :  { %1792 = vmatpush1.bf16.msra.mxu1 %v3177_v23  ;;  %v3275_v23 = vld [vmem:[#allocation7 + $0x7a4] ss:$16 sps:$4 sm:$0xff]  }
  0xb7   :  { %1793 = vmatprep.subr.bf16.mxu1 %v3185_v24  ;;  %v3330_v24 = vld [vmem:[#allocation7 + $0x4c8] ss:$16 sps:$4 sm:$0xff]  }
  0xb8   :  { %1911 = vmatpush1.bf16.msra.mxu0 %v3270_v46  ;;  %v3362_v46 = vld [vmem:[#allocation7 + $0x56c] ss:$16 sps:$4 sm:$0xff]  }
  0xb9   :  { %1912 = vmatprep.subr.bf16.mxu0 %v3278_v47  ;;  %v3297_v47 = vld [vmem:[#allocation7 + $0x228] ss:$16 sps:$4 sm:$0xff]  }
  0xba   :  { %1794 = vmatpush1.bf16.msra.mxu1 %v3183_v27  ;;  %v3281_v27 = vld [vmem:[#allocation7 + $0x7c4] ss:$16 sps:$4 sm:$0xff]  }
  0xbb   :  { %1845 = vmatprep.subr.bf16.mxu1 %v3191_v30  ;;  %v3344_v30 = vld [vmem:[#allocation7 + $0x50c] ss:$16 sps:$4 sm:$0xff]  }
  0xbc   :  { %1913 = vmatpush1.bf16.msra.mxu0 %v3276_v50  ;;  %v3303_v50 = vld [vmem:[#allocation7 + $0x248] ss:$16 sps:$4 sm:$0xff]  }
  0xbd   :  { %1796 = vmatmul.mubr.bf16.vlgmr.msra.gmra.mrb[4].mxu1 %v3785_v33  ;;  %1914 = vmatprep.subr.bf16.mxu0 %v3284_v51  ;;  %v3311_v51 = vld [vmem:[#allocation7 + $0x26c] ss:$16 sps:$4 sm:$0xff]  }
  0xbe   :  { %1846 = vmatpush1.bf16.msra.mxu1 %v3189_v38  ;;  %1877 = vmatprep.mubr.bf16.mxu1 %v3787_v39  ;;  %v3342_v38 = vld [vmem:[#allocation7 + $0x508] ss:$16 sps:$4 sm:$0xff]  }
  0xbf   :  { %1847 = vmatprep.subr.bf16.mxu1 %v3203_v41  ;;  %v3350_v41 = vld [vmem:[#allocation7 + $0x52c] ss:$16 sps:$4 sm:$0xff]  }
  0xc0   :  { %1915 = vmatpush1.bf16.msra.mxu0 %v3282_v55  ;;  %v3309_v55 = vld [vmem:[#allocation7 + $0x268] ss:$16 sps:$4 sm:$0xff]  }
  0xc1   :  { %1916 = vmatprep.subr.bf16.mxu0 %v3290_v56  ;;  %v3317_v56 = vld [vmem:[#allocation7 + $0x28c] ss:$16 sps:$4 sm:$0xff]  }
  0xc2   :  { %1848 = vmatpush1.bf16.msra.mxu1 %v3201_v31  ;;  %v3348_v31 = vld [vmem:[#allocation7 + $0x528] ss:$16 sps:$4 sm:$0xff]  }
  0xc3   :  { %1849 = vmatprep.subr.bf16.mxu1 %v3209_v35  ;;  %v3356_v35 = vld [vmem:[#allocation7 + $0x54c] ss:$16 sps:$4 sm:$0xff]  }
  0xc4   :  { %1917 = vmatpush1.bf16.msra.mxu0 %v3288_v59  ;;  %v3323_v59 = vld [vmem:[#allocation7 + $0x2ac] ss:$16 sps:$4 sm:$0xff]  }
  0xc5   :  { %1968 = vmatprep.subr.bf16.mxu0 %v3296_v60  ;;  %v3378_v60 = vld [vmem:[#allocation7 + $0x5c8] ss:$16 sps:$4 sm:$0xff]  }
  0xc6   :  { %1850 = vmatpush1.bf16.msra.mxu1 %v3207_v44  ;;  %v3299_v44 = vld [vmem:[#allocation7 + $0x22c] ss:$16 sps:$4 sm:$0xff]  }
  0xc7   :  { %1851 = vmatprep.subr.bf16.mxu1 %v3215_v45  ;;  %1919 = vmatmul.mubr.bf16.vlgmr.msra.gmra.mrb[4].mxu0 %v3756_v9  ;;  %v3312_v9 = vld [vmem:[#allocation7 + $0x468] ss:$16 sps:$4 sm:$0xff]  }
  0xc8   :  { %1969 = vmatpush1.bf16.msra.mxu0 %v3294_v63  ;;  %2000 = vmatprep.mubr.bf16.mxu0 %v3774_v40  ;;  %v3255_v40 = vld [vmem:[#allocation7 + $0x740] ss:$16 sps:$4 sm:$0xff]   ;;  %v3354_v45 = vld [vmem:[#allocation7 + $0x548] ss:$16 sps:$4 sm:$0xff]   ;;  %v3329_v63 = vld [vmem:[#allocation7 + $0x2cc] ss:$16 sps:$4 sm:$0xff]  }
  0xc9   :  { %1970 = vmatprep.subr.bf16.mxu0 %v3302_v0  ;;  %v3384_v0 = vld [vmem:[#allocation7 + $0x5e8] ss:$16 sps:$4 sm:$0xff]  }
  0xca   :  { %1852 = vmatpush1.bf16.msra.mxu1 %v3213_v48  ;;  %v3305_v48 = vld [vmem:[#allocation7 + $0x24c] ss:$16 sps:$4 sm:$0xff]  }
  0xcb   :  { %1853 = vmatprep.subr.bf16.mxu1 %v3221_v49  ;;  %v3360_v49 = vld [vmem:[#allocation7 + $0x568] ss:$16 sps:$4 sm:$0xff]  }
  0xcc   :  { %1971 = vmatpush1.bf16.msra.mxu0 %v3300_v3  ;;  %v3435_v3 = vld [vmem:[#allocation9] ss:$8 sps:$4 sm:$0xff]  }
  0xcd   :  { %1972 = vmatprep.subr.bf16.mxu0 %v3308_v37  ;;  %v3437_v37 = vld [vmem:[#allocation9 + $0x4] ss:$8 sps:$4 sm:$0xff]  }
  0xce   :  { %1854 = vmatpush1.bf16.msra.mxu1 %v3219_v52  ;;  %v3366_v52 = vld [vmem:[#allocation7 + $0x588] ss:$16 sps:$4 sm:$0xff]  }
  0xcf   :  { %1855 = vmatprep.subr.bf16.mxu1 %v3227_v54  ;;  %v3374_v54 = vld [vmem:[#allocation7 + $0x5ac] ss:$16 sps:$4 sm:$0xff]  }
  0xd0   :  { %1973 = vmatpush1.bf16.msra.mxu0 %v3306_v6  ;;  %v3341_v6 = vld [vmem:[#allocation7 + $0x30c] ss:$16 sps:$4 sm:$0xff]  }
  0xd1   :  { %1974 = vmatprep.subr.bf16.mxu0 %v3314_v7  ;;  %v3438_v7 = vld [vmem:[#allocation9 + $0x10] ss:$8 sps:$4 sm:$0xff]  }
  0xd2   :  { %1856 = vmatpush1.bf16.msra.mxu1 %v3225_v57  ;;  %v3372_v57 = vld [vmem:[#allocation7 + $0x5a8] ss:$16 sps:$4 sm:$0xff]  }
  0xd3   :  { %1857 = vmatprep.subr.bf16.mxu1 %v3233_v58  ;;  %v3315_v58 = vld [vmem:[#allocation7 + $0x288] ss:$16 sps:$4 sm:$0xff]  }
  0xd4   :  { %1975 = vmatpush1.bf16.msra.mxu0 %v3312_v9  ;;  %v3347_v9 = vld [vmem:[#allocation7 + $0x32c] ss:$16 sps:$4 sm:$0xff]  }
  0xd5   :  { %1976 = vmatprep.subr.bf16.mxu0 %v3320_v11  ;;  %v3441_v11 = vld [vmem:[#allocation9 + $0x20] ss:$8 sps:$4 sm:$0xff]  }
  0xd6   :  { %1858 = vmatpush1.bf16.msra.mxu1 %v3231_v61  ;;  %v3386_v61 = vld [vmem:[#allocation7 + $0x5ec] ss:$16 sps:$4 sm:$0xff]  }
  0xd7   :  { %1859 = vmatprep.subr.bf16.mxu1 %v3239_v62  ;;  %v3321_v62 = vld [vmem:[#allocation7 + $0x2a8] ss:$16 sps:$4 sm:$0xff]  }
  0xd8   :  { %1977 = vmatpush1.bf16.msra.mxu0 %v3318_v14  ;;  %v3353_v14 = vld [vmem:[#allocation7 + $0x34c] ss:$16 sps:$4 sm:$0xff]  }
  0xd9   :  { %1978 = vmatprep.subr.bf16.mxu0 %v3326_v17  ;;  %v3351_v17 = vld [vmem:[#allocation7 + $0x348] ss:$16 sps:$4 sm:$0xff]  }
  0xda   :  { %1860 = vmatpush1.bf16.msra.mxu1 %v3237_v1  ;;  %v3327_v1 = vld [vmem:[#allocation7 + $0x2c8] ss:$16 sps:$4 sm:$0xff]  }
  0xdb   :  { %1861 = vmatprep.subr.bf16.mxu1 %v3245_v2  ;;  %v3335_v2 = vld [vmem:[#allocation7 + $0x2ec] ss:$16 sps:$4 sm:$0xff]  }
  0xdc   :  { %1979 = vmatpush1.bf16.msra.mxu0 %v3324_v20  ;;  %v3447_v20 = vld [vmem:[#allocation9 + $0x40] ss:$8 sps:$4 sm:$0xff]  }
  0xdd   :  { %1980 = vmatprep.subr.bf16.mxu0 %v3332_v21  ;;  %v3452_v21 = vld [vmem:[#allocation9 + $0x54] ss:$8 sps:$4 sm:$0xff]  }
  0xde   :  { %1862 = vmatpush1.bf16.msra.mxu1 %v3243_v4  ;;  %v3440_v4 = vld [vmem:[#allocation9 + $0x14] ss:$8 sps:$4 sm:$0xff]  }
  0xdf   :  { %1863 = vmatprep.subr.bf16.mxu1 %v3251_v5  ;;  %v3333_v5 = vld [vmem:[#allocation7 + $0x2e8] ss:$16 sps:$4 sm:$0xff]  }
  0xe0   :  { %1981 = vmatpush1.bf16.msra.mxu0 %v3330_v24  ;;  %v3450_v24 = vld [vmem:[#allocation9 + $0x50] ss:$8 sps:$4 sm:$0xff]  }
  0xe1   :  { %1982 = vmatprep.subr.bf16.mxu0 %v3338_v25  ;;  %v3455_v25 = vld [vmem:[#allocation9 + $0x64] ss:$8 sps:$4 sm:$0xff]  }
  0xe2   :  { %1864 = vmatpush1.bf16.msra.mxu1 %v3249_v8  ;;  %v3443_v8 = vld [vmem:[#allocation9 + $0x24] ss:$8 sps:$4 sm:$0xff]  }
  0xe3   :  { %1865 = vmatprep.subr.bf16.mxu1 %v3257_v10  ;;  %v3339_v10 = vld [vmem:[#allocation7 + $0x308] ss:$16 sps:$4 sm:$0xff]  }
  0xe4   :  { %1983 = vmatpush1.bf16.msra.mxu0 %v3336_v29  ;;  %v3453_v29 = vld [vmem:[#allocation9 + $0x60] ss:$8 sps:$4 sm:$0xff]  }
  0xe5   :  { %1984 = vmatprep.subr.bf16.mxu0 %v3344_v30  ;;  %v3458_v30 = vld [vmem:[#allocation9 + $0x74] ss:$8 sps:$4 sm:$0xff]  }
  0xe6   :  { %1866 = vmatpush1.bf16.msra.mxu1 %v3255_v40  ;;  %v3446_v40 = vld [vmem:[#allocation9 + $0x34] ss:$8 sps:$4 sm:$0xff]  }
  0xe7   :  { %1867 = vmatprep.subr.bf16.mxu1 %v3263_v13  ;;  %v3345_v13 = vld [vmem:[#allocation7 + $0x328] ss:$16 sps:$4 sm:$0xff]  }
  0xe8   :  { %1985 = vmatpush1.bf16.msra.mxu0 %v3342_v38  ;;  %v3456_v38 = vld [vmem:[#allocation9 + $0x70] ss:$8 sps:$4 sm:$0xff]  }
  0xe9   :  { %1986 = vmatprep.subr.bf16.mxu0 %v3350_v41  ;;  %v3461_v41 = vld [vmem:[#allocation9 + $0x84] ss:$8 sps:$4 sm:$0xff]  }
  0xea   :  { %1868 = vmatpush1.bf16.msra.mxu1 %v3261_v15  ;;  %v3444_v15 = vld [vmem:[#allocation9 + $0x30] ss:$8 sps:$4 sm:$0xff]  }
  0xeb   :  { %1869 = vmatprep.subr.bf16.mxu1 %v3269_v18  ;;  %v3359_v18 = vld [vmem:[#allocation7 + $0x36c] ss:$16 sps:$4 sm:$0xff]  }
  0xec   :  { %1987 = vmatpush1.bf16.msra.mxu0 %v3348_v31  ;;  %v3459_v31 = vld [vmem:[#allocation9 + $0x80] ss:$8 sps:$4 sm:$0xff]  }
  0xed   :  { %1988 = vmatprep.subr.bf16.mxu0 %v3356_v35  ;;  %v3464_v35 = vld [vmem:[#allocation9 + $0x94] ss:$8 sps:$4 sm:$0xff]  }
  0xee   :  { %1870 = vmatpush1.bf16.msra.mxu1 %v3267_v22  ;;  %v3357_v22 = vld [vmem:[#allocation7 + $0x368] ss:$16 sps:$4 sm:$0xff]  }
  0xef   :  { %1871 = vmatprep.subr.bf16.mxu1 %v3275_v23  ;;  %v3365_v23 = vld [vmem:[#allocation7 + $0x38c] ss:$16 sps:$4 sm:$0xff]  }
  0xf0   :  { %1989 = vmatpush1.bf16.msra.mxu0 %v3354_v45  ;;  %v3462_v45 = vld [vmem:[#allocation9 + $0x90] ss:$8 sps:$4 sm:$0xff]  }
  0xf1   :  { %1990 = vmatprep.subr.bf16.mxu0 %v3362_v46  ;;  %v3467_v46 = vld [vmem:[#allocation9 + $0xa4] ss:$8 sps:$4 sm:$0xff]  }
  0xf2   :  { %1872 = vmatpush1.bf16.msra.mxu1 %v3273_v26  ;;  %v3363_v26 = vld [vmem:[#allocation7 + $0x388] ss:$16 sps:$4 sm:$0xff]  }
  0xf3   :  { %1873 = vmatprep.subr.bf16.mxu1 %v3281_v27  ;;  %v3371_v27 = vld [vmem:[#allocation7 + $0x3ac] ss:$16 sps:$4 sm:$0xff]  }
  0xf4   :  { %1991 = vmatpush1.bf16.msra.mxu0 %v3360_v49  ;;  %v3465_v49 = vld [vmem:[#allocation9 + $0xa0] ss:$8 sps:$4 sm:$0xff]  }
  0xf5   :  { %1992 = vmatprep.subr.bf16.mxu0 %v3368_v36  ;;  %v3470_v36 = vld [vmem:[#allocation9 + $0xb4] ss:$8 sps:$4 sm:$0xff]  }
  0xf6   :  { %1874 = vmatpush1.bf16.msra.mxu1 %v3279_v32  ;;  %v3369_v32 = vld [vmem:[#allocation7 + $0x3a8] ss:$16 sps:$4 sm:$0xff]  }
  0xf7   :  { %1875 = vmatprep.subr.bf16.mxu1 %v3287_v34  ;;  %v3377_v34 = vld [vmem:[#allocation7 + $0x3cc] ss:$16 sps:$4 sm:$0xff]  }
  0xf8   :  { %1993 = vmatpush1.bf16.msra.mxu0 %v3366_v52  ;;  %v3468_v52 = vld [vmem:[#allocation9 + $0xb0] ss:$8 sps:$4 sm:$0xff]  }
  0xf9   :  { %1994 = vmatprep.subr.bf16.mxu0 %v3374_v54  ;;  %v3473_v54 = vld [vmem:[#allocation9 + $0xc4] ss:$8 sps:$4 sm:$0xff]  }
  0xfa   :  { %1876 = vmatpush1.bf16.msra.mxu1 %v3285_v19  ;;  %v3375_v19 = vld [vmem:[#allocation7 + $0x3c8] ss:$16 sps:$4 sm:$0xff]  }
  0xfb   :  { %1927 = vmatprep.subr.bf16.mxu1 %v3293_v28  ;;  %v3383_v28 = vld [vmem:[#allocation7 + $0x3ec] ss:$16 sps:$4 sm:$0xff]  }
  0xfc   :  { %1995 = vmatpush1.bf16.msra.mxu0 %v3372_v57  ;;  %v3471_v57 = vld [vmem:[#allocation9 + $0xc0] ss:$8 sps:$4 sm:$0xff]  }
  0xfd   :  { %1878 = vmatmul.mubr.bf16.vlgmr.msra.gmra.mrb[8].mxu1 %v3795_v43 }
  0xfe   :  { %1928 = vmatpush1.bf16.msra.mxu1 %v3291_v42  ;;  %1959 = vmatprep.mubr.bf16.mxu1 %v3758_v12  ;;  %v3380_v12 = vld [vmem:[#allocation7 + $0x5cc] ss:$16 sps:$4 sm:$0xff]   ;;  %v3381_v42 = vld [vmem:[#allocation7 + $0x3e8] ss:$16 sps:$4 sm:$0xff]  }
  0xff   :  { %1929 = vmatprep.subr.bf16.mxu1 %v3299_v44  ;;  %1996 = vmatprep.subr.bf16.mxu0 %v3380_v12  ;;  %v3389_v44 = vld [vmem:[#allocation7 + $0x60c] ss:$16 sps:$4 sm:$0xff]  }
 0x100   :  { %1997 = vmatpush1.bf16.msra.mxu0 %v3378_v60  ;;  %v3401_v12 = vld [vmem:[#allocation7 + $0x68c] ss:$16 sps:$4 sm:$0xff]  }
 0x101   :  { %1998 = vmatprep.subr.bf16.mxu0 %v3386_v61  ;;  %v3407_v60 = vld [vmem:[#allocation7 + $0x6cc] ss:$16 sps:$4 sm:$0xff]  }
 0x102   :  { %1930 = vmatpush1.bf16.msra.mxu1 %v3297_v47  ;;  %v3387_v47 = vld [vmem:[#allocation7 + $0x608] ss:$16 sps:$4 sm:$0xff]   ;;  %v3476_v61 = vld [vmem:[#allocation9 + $0xd4] ss:$8 sps:$4 sm:$0xff]  }
 0x103   :  { %1931 = vmatprep.subr.bf16.mxu1 %v3305_v48  ;;  %v3392_v48 = vld [vmem:[#allocation7 + $0x62c] ss:$16 sps:$4 sm:$0xff]  }
 0x104   :  { %1999 = vmatpush1.bf16.msra.mxu0 %v3384_v0 }
 0x105   :  { %2499 = vmatprep.subr.bf16.mxu0 %v3437_v37  ;;  %v3410_v37 = vld [vmem:[#allocation7 + $0x6ec] ss:$16 sps:$4 sm:$0xff]  }
 0x106   :  { %1932 = vmatpush1.bf16.msra.mxu1 %v3303_v50  ;;  %v3390_v50 = vld [vmem:[#allocation7 + $0x628] ss:$16 sps:$4 sm:$0xff]  }
 0x107   :  { %1933 = vmatprep.subr.bf16.mxu1 %v3311_v51  ;;  %2001 = vmatmul.mubr.bf16.vlgmr.msra.gmra.mrb[8].mxu0 %v3777_v53  ;;  %v3449_v53 = vld [vmem:[#allocation9 + $0x44] ss:$8 sps:$4 sm:$0xff]  }
 0x108   :  { %2500 = vmatpush1.bf16.msra.mxu0 %v3435_v3  ;;  %v3395_v51 = vld [vmem:[#allocation7 + $0x64c] ss:$16 sps:$4 sm:$0xff]  }
 0x109   :  { %2501 = vmatprep.subr.bf16.mxu0 %v3440_v4  ;;  %v3479_v4 = vld [vmem:[#allocation9 + $0xe4] ss:$8 sps:$4 sm:$0xff]  }
 0x10a   :  { %1934 = vmatpush1.bf16.msra.mxu1 %v3309_v55  ;;  %v3393_v55 = vld [vmem:[#allocation7 + $0x648] ss:$16 sps:$4 sm:$0xff]  }
 0x10b   :  { %1935 = vmatprep.subr.bf16.mxu1 %v3317_v56  ;;  %v3398_v56 = vld [vmem:[#allocation7 + $0x66c] ss:$16 sps:$4 sm:$0xff]  }
 0x10c   :  { %2502 = vmatpush1.bf16.msra.mxu0 %v3438_v7  ;;  %v3413_v7 = vld [vmem:[#allocation7 + $0x70c] ss:$16 sps:$4 sm:$0xff]  }
 0x10d   :  { %2503 = vmatprep.subr.bf16.mxu0 %v3443_v8  ;;  %v3482_v8 = vld [vmem:[#allocation9 + $0xf4] ss:$8 sps:$4 sm:$0xff]  }
 0x10e   :  { %1936 = vmatpush1.bf16.msra.mxu1 %v3315_v58  ;;  %v3404_v58 = vld [vmem:[#allocation7 + $0x6ac] ss:$16 sps:$4 sm:$0xff]  }
 0x10f   :  { %1937 = vmatprep.subr.bf16.mxu1 %v3323_v59  ;;  %v3402_v59 = vld [vmem:[#allocation7 + $0x6a8] ss:$16 sps:$4 sm:$0xff]  }
 0x110   :  { %2504 = vmatpush1.bf16.msra.mxu0 %v3441_v11  ;;  %v3416_v11 = vld [vmem:[#allocation7 + $0x72c] ss:$16 sps:$4 sm:$0xff]  }
 0x111   :  { %2505 = vmatprep.subr.bf16.mxu0 %v3446_v40  ;;  %v3414_v40 = vld [vmem:[#allocation7 + $0x728] ss:$16 sps:$4 sm:$0xff]  }
 0x112   :  { %1938 = vmatpush1.bf16.msra.mxu1 %v3321_v62 }
 0x113   :  { %1939 = vmatprep.subr.bf16.mxu1 %v3329_v63  ;;  %v3474_v63 = vld [vmem:[#allocation9 + $0xd0] ss:$8 sps:$4 sm:$0xff]  }
 0x114   :  { %2506 = vmatpush1.bf16.msra.mxu0 %v3444_v15  ;;  %v3422_v15 = vld [vmem:[#allocation7 + $0x76c] ss:$16 sps:$4 sm:$0xff]  }
 0x115   :  { %2507 = vmatprep.subr.bf16.mxu0 %v3449_v53  ;;  %v3420_v53 = vld [vmem:[#allocation7 + $0x768] ss:$16 sps:$4 sm:$0xff]  }
 0x116   :  { %1940 = vmatpush1.bf16.msra.mxu1 %v3327_v1 }
 0x117   :  { %1941 = vmatprep.subr.bf16.mxu1 %v3335_v2  ;;  %v3405_v2 = vld [vmem:[#allocation7 + $0x6c8] ss:$16 sps:$4 sm:$0xff]  }
 0x118   :  { %2508 = vmatpush1.bf16.msra.mxu0 %v3447_v20 }
 0x119   :  { %2509 = vmatprep.subr.bf16.mxu0 %v3452_v21  ;;  %v3428_v21 = vld [vmem:[#allocation7 + $0x7ac] ss:$16 sps:$4 sm:$0xff]  }
 0x11a   :  { %1942 = vmatpush1.bf16.msra.mxu1 %v3333_v5  ;;  %v3477_v5 = vld [vmem:[#allocation9 + $0xe0] ss:$8 sps:$4 sm:$0xff]  }
 0x11b   :  { %1943 = vmatprep.subr.bf16.mxu1 %v3341_v6  ;;  %v3408_v6 = vld [vmem:[#allocation7 + $0x6e8] ss:$16 sps:$4 sm:$0xff]  }
 0x11c   :  { %2510 = vmatpush1.bf16.msra.mxu0 %v3450_v24 }
 0x11d   :  { %2511 = vmatprep.subr.bf16.mxu0 %v3455_v25  ;;  %v3426_v25 = vld [vmem:[#allocation7 + $0x7a8] ss:$16 sps:$4 sm:$0xff]  }
 0x11e   :  { %1944 = vmatpush1.bf16.msra.mxu1 %v3339_v10  ;;  %v3480_v10 = vld [vmem:[#allocation9 + $0xf0] ss:$8 sps:$4 sm:$0xff]  }
 0x11f   :  { %1945 = vmatprep.subr.bf16.mxu1 %v3347_v9  ;;  %v3411_v9 = vld [vmem:[#allocation7 + $0x708] ss:$16 sps:$4 sm:$0xff]  }
 0x120   :  { %2512 = vmatpush1.bf16.msra.mxu0 %v3453_v29  ;;  %v3434_v29 = vld [vmem:[#allocation7 + $0x7ec] ss:$16 sps:$4 sm:$0xff]  }
 0x121   :  { %2513 = vmatprep.subr.bf16.mxu0 %v3458_v30  ;;  %v3432_v30 = vld [vmem:[#allocation7 + $0x7e8] ss:$16 sps:$4 sm:$0xff]  }
 0x122   :  { %1946 = vmatpush1.bf16.msra.mxu1 %v3345_v13  ;;  %v3419_v13 = vld [vmem:[#allocation7 + $0x74c] ss:$16 sps:$4 sm:$0xff]  }
 0x123   :  { %1947 = vmatprep.subr.bf16.mxu1 %v3353_v14  ;;  %v3417_v14 = vld [vmem:[#allocation7 + $0x748] ss:$16 sps:$4 sm:$0xff]  }
 0x124   :  { %2514 = vmatpush1.bf16.msra.mxu0 %v3456_v38 }
 0x125   :  { %2515 = vmatprep.subr.bf16.mxu0 %v3461_v41 }
 0x126   :  { %1948 = vmatpush1.bf16.msra.mxu1 %v3351_v17  ;;  %v3425_v17 = vld [vmem:[#allocation7 + $0x78c] ss:$16 sps:$4 sm:$0xff]  }
 0x127   :  { %1949 = vmatprep.subr.bf16.mxu1 %v3359_v18  ;;  %v3423_v18 = vld [vmem:[#allocation7 + $0x788] ss:$16 sps:$4 sm:$0xff]  }
 0x128   :  { %2516 = vmatpush1.bf16.msra.mxu0 %v3459_v31 }
 0x129   :  { %2517 = vmatprep.subr.bf16.mxu0 %v3464_v35 }
 0x12a   :  { %1950 = vmatpush1.bf16.msra.mxu1 %v3357_v22 }
 0x12b   :  { %1951 = vmatprep.subr.bf16.mxu1 %v3365_v23 }
 0x12c   :  { %2518 = vmatpush1.bf16.msra.mxu0 %v3462_v45 }
 0x12d   :  { %2519 = vmatprep.subr.bf16.mxu0 %v3467_v46 }
 0x12e   :  { %1952 = vmatpush1.bf16.msra.mxu1 %v3363_v26  ;;  %v3431_v26 = vld [vmem:[#allocation7 + $0x7cc] ss:$16 sps:$4 sm:$0xff]  }
 0x12f   :  { %1953 = vmatprep.subr.bf16.mxu1 %v3371_v27  ;;  %v3429_v27 = vld [vmem:[#allocation7 + $0x7c8] ss:$16 sps:$4 sm:$0xff]  }
 0x130   :  { %2520 = vmatpush1.bf16.msra.mxu0 %v3465_v49  ;;  %v3816_v49 = vsub.s32 1, %v3726_v16 }
 0x131   :  { %2521 = vmatprep.subr.bf16.mxu0 %v3470_v36 }
 0x132   :  { %1954 = vmatpush1.bf16.msra.mxu1 %v3369_v32 }
 0x133   :  { %1955 = vmatprep.subr.bf16.mxu1 %v3377_v34 }
 0x134   :  { %2522 = vmatpush1.bf16.msra.mxu0 %v3468_v52 }
 0x135   :  { %2523 = vmatprep.subr.bf16.mxu0 %v3473_v54 }
 0x136   :  { %1956 = vmatpush1.bf16.msra.mxu1 %v3375_v19 }
 0x137   :  { %1957 = vmatprep.subr.bf16.mxu1 %v3383_v28 }
 0x138   :  { %2524 = vmatpush1.bf16.msra.mxu0 %v3471_v57 }
 0x139   :  { %2525 = vmatprep.subr.bf16.mxu0 %v3476_v61 }
 0x13a   :  { %1958 = vmatpush1.bf16.msra.mxu1 %v3381_v42  ;;  %v3485_v42 = vld [vmem:[#allocation9 + $0x104] ss:$8 sps:$4 sm:$0xff]  }
 0x13b   :  { %2009 = vmatprep.subr.bf16.mxu1 %v3389_v44 }
 0x13c   :  { %2526 = vmatpush1.bf16.msra.mxu0 %v3474_v63 }
 0x13d   :  { %1960 = vmatmul.mubr.bf16.vlgmr.msra.gmra.mrb[12].mxu1 %v3785_v33  ;;  %v3396_v33 = vld [vmem:[#allocation7 + $0x668] ss:$16 sps:$4 sm:$0xff]   ;;  %2527 = vmatprep.subr.bf16.mxu0 %v3479_v4 }
 0x13e   :  { %2010 = vmatpush1.bf16.msra.mxu1 %v3387_v47  ;;  %2041 = vmatprep.mubr.bf16.mxu1 %v3787_v39  ;;  %v3399_v39 = vld [vmem:[#allocation7 + $0x688] ss:$16 sps:$4 sm:$0xff]  }
 0x13f   :  { %2011 = vmatprep.subr.bf16.mxu1 %v3392_v48  ;;  %v3808_v48 = vsub.s32 0, %v3726_v16  ;;  %v3492_v4 = vld [vmem:[#allocation9 + $0x130] ss:$8 sps:$4 sm:$0xff]  }
 0x140   :  { %2528 = vmatpush1.bf16.msra.mxu0 %v3477_v5  ;;  %v3497_v5 = vld [vmem:[#allocation9 + $0x144] ss:$8 sps:$4 sm:$0xff]  }
 0x141   :  { %2529 = vmatprep.subr.bf16.mxu0 %v3482_v8 }
 0x142   :  { %2012 = vmatpush1.bf16.msra.mxu1 %v3390_v50 }
 0x143   :  { %2013 = vmatprep.subr.bf16.mxu1 %v3395_v51 }
 0x144   :  { %2530 = vmatpush1.bf16.msra.mxu0 %v3480_v10  ;;  %v3500_v10 = vld [vmem:[#allocation9 + $0x154] ss:$8 sps:$4 sm:$0xff]  }
 0x145   :  { %2540 = vmatprep.subr.bf16.mxu0 %v3485_v42 }
 0x146   :  { %2014 = vmatpush1.bf16.msra.mxu1 %v3393_v55 }
 0x147   :  { %2015 = vmatprep.subr.bf16.mxu1 %v3398_v56 }
 0x14a   :  { %2016 = vmatpush1.bf16.msra.mxu1 %v3396_v33 }
 0x14b   :  { %2017 = vmatprep.subr.bf16.mxu1 %v3401_v12 }
 0x14e   :  { %2018 = vmatpush1.bf16.msra.mxu1 %v3399_v39 }
 0x14f   :  { %2019 = vmatprep.subr.bf16.mxu1 %v3404_v58 }
 0x150   :  { %v1756_v62 = vpop.f32.mrb[0].mxu1 }
 0x151   :  { %v1758_v0 = vpop.f32.mrb[1].mxu1 }
 0x152   :  { %v1760_v1 = vpop.f32.mrb[2].mxu1  ;;  %2020 = vmatpush1.bf16.msra.mxu1 %v3402_v59 }
 0x153   :  { %v1761_v3 = vpop.f32.mrb[3].mxu1  ;;  %2021 = vmatprep.subr.bf16.mxu1 %v3407_v60  ;;  %v3486_v1 = vld [vmem:[#allocation9 + $0x110] ss:$8 sps:$4 sm:$0xff]  }
 0x154   :  { %v3489_v3 = vld [vmem:[#allocation9 + $0x120] ss:$8 sps:$4 sm:$0xff]  }
 0x156   :  { %2022 = vmatpush1.bf16.msra.mxu1 %v3405_v2  ;;  %v3491_v2 = vld [vmem:[#allocation9 + $0x124] ss:$8 sps:$4 sm:$0xff]  }
 0x157   :  { %2023 = vmatprep.subr.bf16.mxu1 %v3410_v37  ;;  %v3494_v37 = vld [vmem:[#allocation9 + $0x134] ss:$8 sps:$4 sm:$0xff]  }
 0x15a   :  { %2024 = vmatpush1.bf16.msra.mxu1 %v3408_v6  ;;  %v1838_v20 = vpop.f32.mrb[0].mxu0 }
 0x15b   :  { %2025 = vmatprep.subr.bf16.mxu1 %v3413_v7  ;;  %v1840_v22 = vpop.f32.mrb[1].mxu0  ;;  %v3495_v7 = vld [vmem:[#allocation9 + $0x140] ss:$8 sps:$4 sm:$0xff]  }
 0x15c   :  { %v1842_v23 = vpop.f32.mrb[2].mxu0 }
 0x15d   :  { %v1843_v24 = vpop.f32.mrb[3].mxu0  ;;  %v3513_v23 = vld [vmem:[#allocation9 + $0x1a0] ss:$8 sps:$4 sm:$0xff]  }
 0x15e   :  { %2026 = vmatpush1.bf16.msra.mxu1 %v3411_v9  ;;  %v3518_v24 = vld [vmem:[#allocation9 + $0x1b4] ss:$8 sps:$4 sm:$0xff]  }
 0x15f   :  { %2027 = vmatprep.subr.bf16.mxu1 %v3416_v11 }
 0x162   :  { %2028 = vmatpush1.bf16.msra.mxu1 %v3414_v40  ;;  %v3498_v40 = vld [vmem:[#allocation9 + $0x150] ss:$8 sps:$4 sm:$0xff]  }
 0x163   :  { %2029 = vmatprep.subr.bf16.mxu1 %v3419_v13  ;;  %v3503_v13 = vld [vmem:[#allocation9 + $0x164] ss:$8 sps:$4 sm:$0xff]  }
 0x166   :  { %2030 = vmatpush1.bf16.msra.mxu1 %v3417_v14  ;;  %v3501_v14 = vld [vmem:[#allocation9 + $0x160] ss:$8 sps:$4 sm:$0xff]  }
 0x167   :  { %2031 = vmatprep.subr.bf16.mxu1 %v3422_v15  ;;  %v3506_v15 = vld [vmem:[#allocation9 + $0x174] ss:$8 sps:$4 sm:$0xff]  }
 0x16a   :  { %2032 = vmatpush1.bf16.msra.mxu1 %v3420_v53  ;;  %v3504_v53 = vld [vmem:[#allocation9 + $0x170] ss:$8 sps:$4 sm:$0xff]  }
 0x16b   :  { %2033 = vmatprep.subr.bf16.mxu1 %v3425_v17  ;;  %v3509_v17 = vld [vmem:[#allocation9 + $0x184] ss:$8 sps:$4 sm:$0xff]  }
 0x16e   :  { %2034 = vmatpush1.bf16.msra.mxu1 %v3423_v18  ;;  %v3507_v18 = vld [vmem:[#allocation9 + $0x180] ss:$8 sps:$4 sm:$0xff]  }
 0x16f   :  { %2035 = vmatprep.subr.bf16.mxu1 %v3428_v21  ;;  %v3510_v21 = vld [vmem:[#allocation9 + $0x190] ss:$8 sps:$4 sm:$0xff]  }
 0x172   :  { %2036 = vmatpush1.bf16.msra.mxu1 %v3426_v25  ;;  %v3516_v25 = vld [vmem:[#allocation9 + $0x1b0] ss:$8 sps:$4 sm:$0xff]  }
 0x173   :  { %2037 = vmatprep.subr.bf16.mxu1 %v3431_v26  ;;  %v3521_v26 = vld [vmem:[#allocation9 + $0x1c4] ss:$8 sps:$4 sm:$0xff]  }
 0x176   :  { %2038 = vmatpush1.bf16.msra.mxu1 %v3429_v27  ;;  %v3519_v27 = vld [vmem:[#allocation9 + $0x1c0] ss:$8 sps:$4 sm:$0xff]  }
 0x177   :  { %2039 = vmatprep.subr.bf16.mxu1 %v3434_v29  ;;  %v3524_v29 = vld [vmem:[#allocation9 + $0x1d4] ss:$8 sps:$4 sm:$0xff]  }
 0x17a   :  { %2040 = vmatpush1.bf16.msra.mxu1 %v3432_v30  ;;  %v3522_v30 = vld [vmem:[#allocation9 + $0x1d0] ss:$8 sps:$4 sm:$0xff]  }
 0x17d   :  { %2042 = vmatmul.mubr.bf16.vlgmr.msra.gmra.mrb[16].mxu1 %v3795_v43  ;;  %v3813_v43 = vld [vmem:[%s3853_s2] sm:$0xf] }
 0x17e   :  { %v2070_v36 = vrot.slane %v3813_v43, %v3808_v48  ;;  %v2074_v51 = vrot.slane %v3813_v43, %v3816_v49 }
 0x190   :  { %v1797_v32 = vpop.f32.mrb[4].mxu1 }
 0x191   :  { %v1798_v34 = vadd.f32 %v1797_v32, %v1756_v62  ;;  %v1799_v38 = vpop.f32.mrb[5].mxu1  ;;  %v3483_v62 = vld [vmem:[#allocation9 + $0x100] ss:$8 sps:$4 sm:$0xff]   ;;  %v3527_v32 = vld [vmem:[#allocation9 + $0x1e4] ss:$8 sps:$4 sm:$0xff]  }
 0x192   :  { %v1800_v41 = vadd.f32 %v1799_v38, %v1758_v0  ;;  %v1801_v19 = vpop.f32.mrb[6].mxu1  ;;  %v3488_v0 = vld [vmem:[#allocation9 + $0x114] ss:$8 sps:$4 sm:$0xff]  }
 0x193   :  { %v1839_v28 = vadd.f32 %v1838_v20, %v1798_v34  ;;  %v1802_v31 = vpop.f32.mrb[7].mxu1  ;;  %v3512_v20 = vld [vmem:[#allocation9 + $0x194] ss:$8 sps:$4 sm:$0xff]  }
 0x194   :  { %v1841_v35 = vadd.f32 %v1840_v22, %v1800_v41  ;;  %v3515_v22 = vld [vmem:[#allocation9 + $0x1a4] ss:$8 sps:$4 sm:$0xff]   ;;  %v3525_v31 = vld [vmem:[#allocation9 + $0x1e0] ss:$8 sps:$4 sm:$0xff]  }
 0x19a   :  { %v3803_v44 = vpop.f32.mrb[4].mxu0 }
 0x19b   :  { %v3805_v45 = vpop.f32.mrb[5].mxu0 }
 0x19c   :  { %v1924_v46 = vpop.f32.mrb[6].mxu0 }
 0x19d   :  { %v1925_v47 = vpop.f32.mrb[7].mxu0  ;;  %v3530_v46 = vld [vmem:[#allocation9 + $0x1f4] ss:$8 sps:$4 sm:$0xff]  }
 0x1d0   :  { %v1879_v50 = vpop.f32.mrb[8].mxu1 }
 0x1d1   :  { %v1880_v52 = vadd.f32 %v1879_v50, %v1839_v28  ;;  %v1881_v54 = vpop.f32.mrb[9].mxu1  ;;  %v2077_v50 = vsub.s32 2, %v3726_v16 }
 0x1d2   :  { %v1882_v55 = vadd.f32 %v1881_v54, %v1841_v35  ;;  %v1883_v56 = vpop.f32.mrb[10].mxu1 }
 0x1d3   :  { %v2087_v57 = vadd.f32 %v2070_v36, %v1880_v52  ;;  %v1884_v33 = vpop.f32.mrb[11].mxu1  ;;  %v3528_v36 = vld [vmem:[#allocation9 + $0x1f0] ss:$8 sps:$4 sm:$0xff]  }
 0x1d4   :  { %v2088_v12 = vadd.f32 %v2074_v51, %v1882_v55  ;;  %v2081_v51 = vsub.s32 3, %v3726_v16  ;;  %v2585_v16 = vld [vmem:[%s3856_s5] sm:$0x3] }
 0x1d5   :  { %v2091_v39 = vmul.f32 0.2, %v2087_v57 }
 0x1d6   :  { %v2092_v58 = vmul.f32 0.2, %v2088_v12 }
 0x1d7   :  { %v2095_v59 = vmax.f32 %v2087_v57, %v2091_v39 }
 0x1d8   :  { %v2096_v60 = vmax.f32 %v2088_v12, %v2092_v58 }
 0x1d9   :  { %v2099_v63 = vpack.c.bf16 %v2095_v59, %v2095_v59 }
 0x1da   :  { %v2100_v61 = vpack.c.bf16 %v2096_v60, %v2096_v60  ;;  %v2002_v6 = vpop.f32.mrb[8].mxu0 }
 0x1db   :  { %v2004_v8 = vpop.f32.mrb[9].mxu0 }
 0x1dc   :  { %2531 = vmatprep.mubr.bf16.mxu0 %v2100_v61  ;;  %v2006_v9 = vpop.f32.mrb[10].mxu0 }
 0x1dd   :  { %2532 = vmatmul.mubr.bf16.vlgmr.msra.gmra.mrb[12].mxu0 %v2099_v63  ;;  %v2007_v11 = vpop.f32.mrb[11].mxu0 }
 0x1de   :  { %2541 = vmatpush1.bf16.msra.mxu0 %v3483_v62 }
 0x1df   :  { %2542 = vmatprep.subr.bf16.mxu0 %v3488_v0  ;;  %v2586_v0 = vld [vmem:[#allocation3] sm:$0x1] }
 0x1e2   :  { %2543 = vmatpush1.bf16.msra.mxu0 %v3486_v1  ;;  %v3637_v1 = vmov 0  }
 0x1e3   :  { %2544 = vmatprep.subr.bf16.mxu0 %v3491_v2  ;;  %3038 = vset.pattern.permute.xlu0 %v3637_v1  ;;  %v2167_v2 = vld [vmem:[%s3855_s4] sm:$0x3]  ;;  %s3638_s4 = smov [#allocation10]  }
 0x1e4   :  { %2589 = vperm.xlu0 %3038, %v2586_v0   ;;  %s2691_s5 = sshll.u32 %s3638_s4, 4  ;;  %s2692_s5 = int_to_ptr.vmem [resolvable:$true] %s2691_s5 }
 0x1e5   :  { %s3601_s21 = scalar_lea.vmem %s2692_s5, 16  ;;  %s3605_s22 = scalar_lea.vmem %s2692_s5, 32 }
 0x1e6   :  { %2545 = vmatpush1.bf16.msra.mxu0 %v3489_v3  ;;  %v2172_v3 = vrot.slane %v2167_v2, %v3808_v48  ;;  %p3602_p10 = scmp.ne.s32.totalorder %s2692_s5, %s3601_s21  ;;  %p3606_p11 = scmp.lt.s32.totalorder %s2692_s5, %s2692_s5 }
 0x1e7   :  { %2546 = vmatprep.subr.bf16.mxu0 %v3494_v37  ;;  %v2176_v37 = vrot.slane %v2167_v2, %v3816_v49  ;;  %p3607_p12 = scmp.lt.s32.totalorder %s3605_s22, %s3601_s21 }
 0x1e9   :  { %p3608_p13 = por %p3607_p12, %p3606_p11 }
 0x1ea   :  { %2547 = vmatpush1.bf16.msra.mxu0 %v3492_v4 }
 0x1eb   :  { %2548 = vmatprep.subr.bf16.mxu0 %v3497_v5  ;;  %p3609_p0 = pnand %p3608_p13, %p3602_p10 }
 0x1ee   :  { %2549 = vmatpush1.bf16.msra.mxu0 %v3495_v7 }
 0x1ef   :  { %2550 = vmatprep.subr.bf16.mxu0 %v3500_v10 }
 0x1f2   :  { %2551 = vmatpush1.bf16.msra.mxu0 %v3498_v40 }
 0x1f3   :  { %2552 = vmatprep.subr.bf16.mxu0 %v3503_v13 }
 0x1f6   :  { %2553 = vmatpush1.bf16.msra.mxu0 %v3501_v14  ;;  %v2600_v14 = vrot.slane %v2585_v16, %v3808_v48 }
 0x1f7   :  { %2554 = vmatprep.subr.bf16.mxu0 %v3506_v15 }
 0x1fa   :  { %2555 = vmatpush1.bf16.msra.mxu0 %v3504_v53 }
 0x1fb   :  { %2556 = vmatprep.subr.bf16.mxu0 %v3509_v17 }
 0x1fe   :  { %2557 = vmatpush1.bf16.msra.mxu0 %v3507_v18 }
 0x1ff   :  { %2558 = vmatprep.subr.bf16.mxu0 %v3512_v20 }
 0x202   :  { %2559 = vmatpush1.bf16.msra.mxu0 %v3510_v21 }
 0x203   :  { %2560 = vmatprep.subr.bf16.mxu0 %v3515_v22 }
 0x206   :  { %2561 = vmatpush1.bf16.msra.mxu0 %v3513_v23 }
 0x207   :  { %2562 = vmatprep.subr.bf16.mxu0 %v3518_v24 }
 0x20a   :  { %2563 = vmatpush1.bf16.msra.mxu0 %v3516_v25 }
 0x20b   :  { %2564 = vmatprep.subr.bf16.mxu0 %v3521_v26 }
 0x20e   :  { %2565 = vmatpush1.bf16.msra.mxu0 %v3519_v27 }
 0x20f   :  { %2566 = vmatprep.subr.bf16.mxu0 %v3524_v29 }
 0x210   :  { %v1961_v34 = vpop.f32.mrb[12].mxu1 }
 0x211   :  { %v1962_v38 = vadd.f32 %v1961_v34, %v3803_v44  ;;  %v1963_v41 = vpop.f32.mrb[13].mxu1  ;;  %v2078_v44 = vrot.slane %v3813_v43, %v2077_v50 }
 0x212   :  { %v1964_v19 = vadd.f32 %v1963_v41, %v3805_v45  ;;  %v1965_v28 = vpop.f32.mrb[14].mxu1  ;;  %2567 = vmatpush1.bf16.msra.mxu0 %v3522_v30  ;;  %v2082_v45 = vrot.slane %v3813_v43, %v2081_v51  ;;  %v2604_v43 = vrot.slane %v2585_v16, %v3816_v49 }
 0x213   :  { %v2003_v35 = vadd.f32 %v2002_v6, %v1962_v38  ;;  %v1966_v42 = vpop.f32.mrb[15].mxu1  ;;  %2568 = vmatprep.subr.bf16.mxu0 %v3527_v32 }
 0x214   :  { %v2005_v47 = vadd.f32 %v2004_v8, %v1964_v19  ;;  %2671 = vmatprep.mubr.f32.mxu1 %v2604_v43 }
 0x216   :  { %2569 = vmatpush1.bf16.msra.mxu0 %v3525_v31 }
 0x217   :  { %2570 = vmatprep.subr.bf16.mxu0 %v3530_v46 }
 0x21a   :  { %2571 = vmatpush1.bf16.msra.mxu0 %v3528_v36 }
 0x250   :  { %v2043_v52 = vpop.f32.mrb[16].mxu1 }
 0x251   :  { %v2044_v54 = vadd.f32 %v2043_v52, %v2003_v35  ;;  %v2045_v55 = vpop.f32.mrb[17].mxu1 }
 0x252   :  { %v2046_v56 = vadd.f32 %v2045_v55, %v2005_v47  ;;  %v2047_v57 = vpop.f32.mrb[18].mxu1 }
 0x253   :  { %v2089_v33 = vadd.f32 %v2078_v44, %v2044_v54  ;;  %v2048_v12 = vpop.f32.mrb[19].mxu1 }
 0x254   :  { %v2090_v39 = vadd.f32 %v2082_v45, %v2046_v56 }
 0x255   :  { %v2093_v58 = vmul.f32 0.2, %v2089_v33 }
 0x256   :  { %v2094_v59 = vmul.f32 0.2, %v2090_v39 }
 0x257   :  { %v2097_v60 = vmax.f32 %v2089_v33, %v2093_v58 }
 0x258   :  { %v2098_v61 = vmax.f32 %v2090_v39, %v2094_v59 }
 0x259   :  { %v2101_v63 = vpack.c.bf16 %v2097_v60, %v2097_v60 }
 0x25a   :  { %v2102_v62 = vpack.c.bf16 %v2098_v61, %v2098_v61 }
 0x25c   :  { %2572 = vmatprep.mubr.bf16.mxu0 %v2102_v62 }
 0x25d   :  { %2573 = vmatmul.mubr.bf16.vlgmr.msra.gmra.mrb[12].mxu0 %v2101_v63 }
 0x263   :  { %v2590_v15 = vpop.permute.xlu0 %2589 }
 0x264   :  { %v2595_v53 = vrot.slane %v2590_v15, %v3808_v48 }
 0x330   :  { %v2574_v4 = vpop.f32.mrb[12].mxu0 }
 0x331   :  { %v3022_v5 = vadd.f32 %v2574_v4, %v2172_v3  ;;  %v2576_v6 = vpop.f32.mrb[13].mxu0 }
 0x332   :  { %v3023_v7 = vadd.f32 %v2576_v6, %v2176_v37  ;;  %v2578_v8 = vpop.f32.mrb[14].mxu0 }
 0x333   :  { %v2581_v10 = vmul.f32 0.2, %v3022_v5  ;;  %v2579_v9 = vpop.f32.mrb[15].mxu0 }
 0x334   :  { %v2582_v11 = vmul.f32 0.2, %v3023_v7 }
 0x335   :  { %v2583_v13 = vmax.f32 %v3022_v5, %v2581_v10 }
 0x336   :  { %v2584_v40 = vmax.f32 %v3023_v7, %v2582_v11 }
 0x338   :  { %2607 = vmatprep.subr.mxu1 %v2584_v40 }
 0x339   :  { %2608 = vmatpush1.xpose.msra.mxu1 %v2583_v13 }
 0x33c   :  { %2672 = vmatmul.mubr.f32.vlgmr.msra.gmra.mrb[20].mxu1 %v2600_v14 }
 0x40f   :  { %v2673_v17 = vpop.f32.mrb[20].mxu1 }
 0x410   :  { %v2674_v49 = vadd.f32 %v2673_v17, %v2595_v53  ;;  %v2675_v18 = vpop.f32.mrb[21].mxu1 }
 0x412   :  { %v3021_v20 = vmul.f32 -1.442695, %v2674_v49 }
 0x414   :  { %3531 = vpow2.f32 %v3021_v20 }
 0x41e   :  { %v3532_v21 = vpop.eup %3531 }
 0x41f   :  { %v2680_v22 = vadd.f32 1.0, %v3532_v21 }
 0x421   :  { %3533 = vrcp.f32 %v2680_v22 }
 0x42b   :  { %v3534_v23 = vpop.eup %3533 }
 0x42c   :  { %2684 = vst.msk [vmem:[#allocation10] sm:$0x1] %vm2683_vm0, %v3534_v23 }
 0x42d   :  { %3612 = shalt.err (!%p3609_p0)
}
 0x42e   :  { %s3613_s25 = scalar_lea.hbm %s3858_s7, 16 }
 0x42f   :  { %p3614_p1 = scmp.ne.s32.totalorder %s3858_s7, %s3613_s25  ;;  %p3617_p2 = scmp.lt.u32.totalorder %s3613_s25, %s3858_s7 }
 0x431   :  { %p3619_p3 = pnand %p3617_p2, %p3614_p1 }
 0x433   :  { %3622 = shalt.err (!%p3619_p3)
}
 0x434   :  { %2694 = dma.vmem_to_hbm [thread:$0]  %s2692_s5, 16, %s3858_s7, [#allocation6]  }
 0x435   :  { %3627 = dma.done.wait [#allocation6], 16  }
 0x436   :  { %3628 = vsyncadd [#allocation6], 4294967280 }
 0x437   :  { %2698 = vsyncpa [#allocation5], 1 }
 0x438   :  { %2699 = vsyncpa [#allocation8], 1 }
 0x439   :  { %2700 = vsyncpa [#allocation6], 1 }

</bundles_post_ra>
